<compile_context>
chip_gen: v7x
topology: tpu7x:2x2x1
jax: 0.10.0
libtpu: 0.0.40
codegen_flags: <defaults>
</compile_context>

<pallas_src>
import functools
import math

import jax
import jax.numpy as jnp
from jax.experimental import pallas as pl
from jax.experimental.pallas import tpu as pltpu


def _round_up(x: int, mult: int) -> int:
    return ((x + mult - 1) // mult) * mult


def _lowrank_rnn_seq_kernel(proj_ref, h0_ref, wrec_ref, b_ref, o_ref, h_acc,
                            *, alpha: float, chunk: int):
    """One grid step = CHUNK RNN timesteps. Hidden state stays in VMEM scratch."""
    c = pl.program_id(0)

    @pl.when(c == 0)
    def _():
        h_acc[...] = h0_ref[...].astype(jnp.float32)

    h = h_acc[...]            # (Bp, Hp) f32, resident across the whole sequence
    bias = b_ref[...]         # (Bp, Hp), pre-broadcast
    wrec = wrec_ref[...]      # (Hp, Hp) = n @ m.T, resident in VMEM

    # Static inner loop over the chunk: each iteration is one timestep.
    for t in range(chunk):
        act = jnp.tanh(h + bias)                                          # VPU/EUP
        rec = jnp.dot(act, wrec, preferred_element_type=jnp.float32)      # MXU
        h = h + alpha * (proj_ref[t] + rec - h)                           # leaky update
        o_ref[t] = h.astype(o_ref.dtype)

    h_acc[...] = h


def lowrank_rnn_sequence(xs, h0, wi, n, m, b, *, alpha: float = 0.2, chunk: int = 16):
    """Apply LowRankRNNCell over a sequence.

    xs: (T, B, input_size), h0: (B, H), wi: (I, H), n/m: (H, rank), b: (1, H).
    Returns all hidden states, shape (T, B, H).
    """
    T, B, I = xs.shape
    Bh, H = h0.shape
    assert Bh == B
    f32 = jnp.float32

    # Collapse the two low-rank matmuls into one (H, H) recurrent weight (exact f32).
    w_rec = jnp.dot(n.astype(f32), m.astype(f32).T,
                    precision=jax.lax.Precision.HIGHEST)

    # Hoist the sequentially-independent input projection out of the recurrent
    # kernel: one big batched matmul instead of T tiny in-kernel matmuls.
    proj = jnp.dot(xs.astype(f32).reshape(T * B, I), wi.astype(f32),
                   precision=jax.lax.Precision.HIGHEST).reshape(T, B, H)

    # Pad to sublane/lane granularity so every vreg/load/store is dense.
    Bp = _round_up(max(B, 8), 8)
    Hp = _round_up(max(H, 128), 128)
    chunk = max(1, min(int(chunk), T))
    Tp = _round_up(T, chunk)

    proj_p = jnp.pad(proj, ((0, Tp - T), (0, Bp - B), (0, Hp - H)))
    h0_p = jnp.pad(h0.astype(f32), ((0, Bp - B), (0, Hp - H)))
    wrec_p = jnp.pad(w_rec, ((0, Hp - H), (0, Hp - H)))
    b_p = jnp.broadcast_to(jnp.pad(b.astype(f32), ((0, 0), (0, Hp - H))), (Bp, Hp))

    kernel = functools.partial(_lowrank_rnn_seq_kernel,
                               alpha=float(alpha), chunk=chunk)

    out = pl.pallas_call(
        kernel,
        out_shape=jax.ShapeDtypeStruct((Tp, Bp, Hp), f32),
        grid_spec=pltpu.PrefetchScalarGridSpec(
            num_scalar_prefetch=0,
            grid=(Tp // chunk,),
            in_specs=[
                # Streamed per-chunk input projections (double-buffered by Pallas).
                pl.BlockSpec((chunk, Bp, Hp), lambda c: (c, 0, 0)),
                # Resident operands (same block every step -> stay in VMEM).
                pl.BlockSpec((Bp, Hp), lambda c: (0, 0)),   # h0
                pl.BlockSpec((Hp, Hp), lambda c: (0, 0)),   # W_rec = n @ m.T
                pl.BlockSpec((Bp, Hp), lambda c: (0, 0)),   # bias, pre-broadcast
            ],
            out_specs=pl.BlockSpec((chunk, Bp, Hp), lambda c: (c, 0, 0)),
            scratch_shapes=[pltpu.VMEM((Bp, Hp), jnp.float32)],  # hidden accumulator
        ),
        compiler_params=pltpu.CompilerParams(
            dimension_semantics=("arbitrary",),  # timesteps are sequentially dependent
        ),
    )(proj_p, h0_p, wrec_p, b_p)

    return out[:T, :B, :H].astype(h0.dtype)


def lowrank_rnn_cell(x, h, wi, n, m, b, *, alpha: float = 0.2):
    """Single-step forward (exact PyTorch module semantics). Returns new hidden (B, H)."""
    return lowrank_rnn_sequence(x[None], h, wi, n, m, b, alpha=alpha, chunk=1)[0]


def _cell_reference(x, h, wi, n, m, b, alpha):
    proj = x @ wi
    rec = jnp.tanh(h + b) @ n @ m.T
    return h + alpha * (-h + proj + rec)


if __name__ == "__main__":
    # Small, module-consistent shapes.
    input_size = 16
    hidden_size = 32
    rank = 4
    batch = 8
    seq_len = 16
    alpha = 0.2

    key = jax.random.PRNGKey(0)
    k_m, k_n, k_wi, k_x, k_h = jax.random.split(key, 5)

    # Deterministic init mirroring the PyTorch __init__:
    #   m ~ N(0, 1/sqrt(rank)), n ~ N(0, 1), b = 0, wi ~ N(0, 1/sqrt(input_size))
    m = jax.random.normal(k_m, (hidden_size, rank), jnp.float32) / math.sqrt(rank)
    n = jax.random.normal(k_n, (hidden_size, rank), jnp.float32)
    b = jnp.zeros((1, hidden_size), jnp.float32)
    wi = jax.random.normal(k_wi, (input_size, hidden_size), jnp.float32) / math.sqrt(input_size)

    xs = jax.random.normal(k_x, (seq_len, batch, input_size), jnp.float32)
    h0 = jax.random.normal(k_h, (batch, hidden_size), jnp.float32)

    # Fused multi-step run (one pallas_call for the whole sequence).
    hs = jax.block_until_ready(lowrank_rnn_sequence(xs, h0, wi, n, m, b, alpha=alpha))

    # Pure-JAX reference: scan of the module forward.
    def step(h, x):
        h_new = _cell_reference(x, h, wi, n, m, b, alpha)
        return h_new, h_new

    _, hs_ref = jax.lax.scan(step, h0, xs)

    assert hs.shape == (seq_len, batch, hidden_size)
    assert jnp.allclose(hs, hs_ref, atol=1e-4, rtol=1e-4)

    # Single-step forward (exact module semantics).
    h1 = jax.block_until_ready(lowrank_rnn_cell(xs[0], h0, wi, n, m, b, alpha=alpha))
    h1_ref = _cell_reference(xs[0], h0, wi, n, m, b, alpha)
    assert h1.shape == (batch, hidden_size)
    assert jnp.allclose(h1, h1_ref, atol=1e-4, rtol=1e-4)

    print("KERNEL_OK")
</pallas_src>

<mosaic_0001>
module attributes {stable_mosaic.version = 11 : i64} {
  func.func @_lowrank_rnn_seq_kernel(%arg0: i32, %arg1: memref<16x8x128xf32, #tpu.memory_space<vmem>>, %arg2: memref<8x128xf32, #tpu.memory_space<vmem>>, %arg3: memref<128x128xf32, #tpu.memory_space<vmem>>, %arg4: memref<8x128xf32, #tpu.memory_space<vmem>>, %arg5: memref<16x8x128xf32, #tpu.memory_space<vmem>>, %arg6: memref<8x128xf32, #tpu.memory_space<vmem>>) attributes {dimension_semantics = [#tpu.dimension_semantics<arbitrary>], iteration_bounds = array<i64: 1>, scalar_prefetch = 0 : i64, scratch_operands = 1 : i64, tpu.core_type = #tpu.core_type<tc>, window_params = [{transform_indices = @transform_0, window_bounds = array<i64: 16, 8, 128>}, {pipeline_mode = #tpu.pipeline_mode<synchronous>, transform_indices = @transform_1, window_bounds = array<i64: 8, 128>}, {pipeline_mode = #tpu.pipeline_mode<synchronous>, transform_indices = @transform_2, window_bounds = array<i64: 128, 128>}, {pipeline_mode = #tpu.pipeline_mode<synchronous>, transform_indices = @transform_3, window_bounds = array<i64: 8, 128>}, {transform_indices = @transform_4, window_bounds = array<i64: 16, 8, 128>}]} {
    %c0_i32 = arith.constant 0 : i32
    %0 = arith.cmpi eq, %arg0, %c0_i32 : i32
    %1 = arith.extui %0 : i1 to i32
    %c0_i32_0 = arith.constant 0 : i32
    %2 = arith.cmpi ne, %1, %c0_i32_0 : i32
    scf.if %2 {
      %c0_120 = arith.constant 0 : index
      %c0_121 = arith.constant 0 : index
      %215 = vector.load %arg2[%c0_120, %c0_121] : memref<8x128xf32, #tpu.memory_space<vmem>>, vector<8x128xf32>
      %c0_122 = arith.constant 0 : index
      %c0_123 = arith.constant 0 : index
      %216 = vector.load %arg6[%c0_122, %c0_123] : memref<8x128xf32, #tpu.memory_space<vmem>>, vector<8x128xf32>
      tpu.vector_store %arg6[%c0_122, %c0_123], %215 {strides = array<i32>} : memref<8x128xf32, #tpu.memory_space<vmem>>, vector<8x128xf32>,
    } else {
    }
    %c0 = arith.constant 0 : index
    %c0_1 = arith.constant 0 : index
    %3 = vector.load %arg6[%c0, %c0_1] : memref<8x128xf32, #tpu.memory_space<vmem>>, vector<8x128xf32>
    %c0_2 = arith.constant 0 : index
    %c0_3 = arith.constant 0 : index
    %4 = vector.load %arg4[%c0_2, %c0_3] : memref<8x128xf32, #tpu.memory_space<vmem>>, vector<8x128xf32>
    %c0_4 = arith.constant 0 : index
    %c0_5 = arith.constant 0 : index
    %5 = vector.load %arg3[%c0_4, %c0_5] : memref<128x128xf32, #tpu.memory_space<vmem>>, vector<128x128xf32>
    %6 = arith.addf %3, %4 : vector<8x128xf32>
    %7 = math.tanh %6 : vector<8x128xf32>
    %cst = arith.constant dense<0.000000e+00> : vector<8x128xf32>
    %8 = tpu.matmul %7, %5, %cst {dimension_numbers = #tpu.dot_dimension_numbers<[1], [0], [0], [1], [0, 0, 1, 1], [], []>} : vector<8x128xf32>, vector<128x128xf32>, vector<8x128xf32> -> vector<8x128xf32>
    %c0_6 = arith.constant 0 : index
    %c0_7 = arith.constant 0 : index
    %c0_8 = arith.constant 0 : index
    %9 = vector.load %arg1[%c0_6, %c0_7, %c0_8] : memref<16x8x128xf32, #tpu.memory_space<vmem>>, vector<1x8x128xf32>
    %10 = vector.shape_cast %9 : vector<1x8x128xf32> to vector<8x128xf32>
    %11 = arith.addf %10, %8 : vector<8x128xf32>
    %12 = arith.subf %11, %3 : vector<8x128xf32>
    %cst_9 = arith.constant 2.000000e-01 : f32
    %13 = vector.broadcast %cst_9 : f32 to vector<8x128xf32>
    %14 = arith.mulf %13, %12 : vector<8x128xf32>
    %15 = arith.addf %3, %14 : vector<8x128xf32>
    %c0_10 = arith.constant 0 : index
    %c0_11 = arith.constant 0 : index
    %c0_12 = arith.constant 0 : index
    %16 = vector.load %arg5[%c0_10, %c0_11, %c0_12] : memref<16x8x128xf32, #tpu.memory_space<vmem>>, vector<1x8x128xf32>
    %17 = vector.shape_cast %16 : vector<1x8x128xf32> to vector<8x128xf32>
    %18 = vector.shape_cast %15 : vector<8x128xf32> to vector<1x8x128xf32>
    tpu.vector_store %arg5[%c0_10, %c0_11, %c0_12], %18 {strides = array<i32>} : memref<16x8x128xf32, #tpu.memory_space<vmem>>, vector<1x8x128xf32>,
    %19 = arith.addf %15, %4 : vector<8x128xf32>
    %20 = math.tanh %19 : vector<8x128xf32>
    %cst_13 = arith.constant dense<0.000000e+00> : vector<8x128xf32>
    %21 = tpu.matmul %20, %5, %cst_13 {dimension_numbers = #tpu.dot_dimension_numbers<[1], [0], [0], [1], [0, 0, 1, 1], [], []>} : vector<8x128xf32>, vector<128x128xf32>, vector<8x128xf32> -> vector<8x128xf32>
    %c1 = arith.constant 1 : index
    %c0_14 = arith.constant 0 : index
    %c0_15 = arith.constant 0 : index
    %22 = vector.load %arg1[%c1, %c0_14, %c0_15] : memref<16x8x128xf32, #tpu.memory_space<vmem>>, vector<1x8x128xf32>
    %23 = vector.shape_cast %22 : vector<1x8x128xf32> to vector<8x128xf32>
    %24 = arith.addf %23, %21 : vector<8x128xf32>
    %25 = arith.subf %24, %15 : vector<8x128xf32>
    %cst_16 = arith.constant 2.000000e-01 : f32
    %26 = vector.broadcast %cst_16 : f32 to vector<8x128xf32>
    %27 = arith.mulf %26, %25 : vector<8x128xf32>
    %28 = arith.addf %15, %27 : vector<8x128xf32>
    %c1_17 = arith.constant 1 : index
    %c0_18 = arith.constant 0 : index
    %c0_19 = arith.constant 0 : index
    %29 = vector.load %arg5[%c1_17, %c0_18, %c0_19] : memref<16x8x128xf32, #tpu.memory_space<vmem>>, vector<1x8x128xf32>
    %30 = vector.shape_cast %29 : vector<1x8x128xf32> to vector<8x128xf32>
    %31 = vector.shape_cast %28 : vector<8x128xf32> to vector<1x8x128xf32>
    tpu.vector_store %arg5[%c1_17, %c0_18, %c0_19], %31 {strides = array<i32>} : memref<16x8x128xf32, #tpu.memory_space<vmem>>, vector<1x8x128xf32>,
    %32 = arith.addf %28, %4 : vector<8x128xf32>
    %33 = math.tanh %32 : vector<8x128xf32>
    %cst_20 = arith.constant dense<0.000000e+00> : vector<8x128xf32>
    %34 = tpu.matmul %33, %5, %cst_20 {dimension_numbers = #tpu.dot_dimension_numbers<[1], [0], [0], [1], [0, 0, 1, 1], [], []>} : vector<8x128xf32>, vector<128x128xf32>, vector<8x128xf32> -> vector<8x128xf32>
    %c2 = arith.constant 2 : index
    %c0_21 = arith.constant 0 : index
    %c0_22 = arith.constant 0 : index
    %35 = vector.load %arg1[%c2, %c0_21, %c0_22] : memref<16x8x128xf32, #tpu.memory_space<vmem>>, vector<1x8x128xf32>
    %36 = vector.shape_cast %35 : vector<1x8x128xf32> to vector<8x128xf32>
    %37 = arith.addf %36, %34 : vector<8x128xf32>
    %38 = arith.subf %37, %28 : vector<8x128xf32>
    %cst_23 = arith.constant 2.000000e-01 : f32
    %39 = vector.broadcast %cst_23 : f32 to vector<8x128xf32>
    %40 = arith.mulf %39, %38 : vector<8x128xf32>
    %41 = arith.addf %28, %40 : vector<8x128xf32>
    %c2_24 = arith.constant 2 : index
    %c0_25 = arith.constant 0 : index
    %c0_26 = arith.constant 0 : index
    %42 = vector.load %arg5[%c2_24, %c0_25, %c0_26] : memref<16x8x128xf32, #tpu.memory_space<vmem>>, vector<1x8x128xf32>
    %43 = vector.shape_cast %42 : vector<1x8x128xf32> to vector<8x128xf32>
    %44 = vector.shape_cast %41 : vector<8x128xf32> to vector<1x8x128xf32>
    tpu.vector_store %arg5[%c2_24, %c0_25, %c0_26], %44 {strides = array<i32>} : memref<16x8x128xf32, #tpu.memory_space<vmem>>, vector<1x8x128xf32>,
    %45 = arith.addf %41, %4 : vector<8x128xf32>
    %46 = math.tanh %45 : vector<8x128xf32>
    %cst_27 = arith.constant dense<0.000000e+00> : vector<8x128xf32>
    %47 = tpu.matmul %46, %5, %cst_27 {dimension_numbers = #tpu.dot_dimension_numbers<[1], [0], [0], [1], [0, 0, 1, 1], [], []>} : vector<8x128xf32>, vector<128x128xf32>, vector<8x128xf32> -> vector<8x128xf32>
    %c3 = arith.constant 3 : index
    %c0_28 = arith.constant 0 : index
    %c0_29 = arith.constant 0 : index
    %48 = vector.load %arg1[%c3, %c0_28, %c0_29] : memref<16x8x128xf32, #tpu.memory_space<vmem>>, vector<1x8x128xf32>
    %49 = vector.shape_cast %48 : vector<1x8x128xf32> to vector<8x128xf32>
    %50 = arith.addf %49, %47 : vector<8x128xf32>
    %51 = arith.subf %50, %41 : vector<8x128xf32>
    %cst_30 = arith.constant 2.000000e-01 : f32
    %52 = vector.broadcast %cst_30 : f32 to vector<8x128xf32>
    %53 = arith.mulf %52, %51 : vector<8x128xf32>
    %54 = arith.addf %41, %53 : vector<8x128xf32>
    %c3_31 = arith.constant 3 : index
    %c0_32 = arith.constant 0 : index
    %c0_33 = arith.constant 0 : index
    %55 = vector.load %arg5[%c3_31, %c0_32, %c0_33] : memref<16x8x128xf32, #tpu.memory_space<vmem>>, vector<1x8x128xf32>
    %56 = vector.shape_cast %55 : vector<1x8x128xf32> to vector<8x128xf32>
    %57 = vector.shape_cast %54 : vector<8x128xf32> to vector<1x8x128xf32>
    tpu.vector_store %arg5[%c3_31, %c0_32, %c0_33], %57 {strides = array<i32>} : memref<16x8x128xf32, #tpu.memory_space<vmem>>, vector<1x8x128xf32>,
    %58 = arith.addf %54, %4 : vector<8x128xf32>
    %59 = math.tanh %58 : vector<8x128xf32>
    %cst_34 = arith.constant dense<0.000000e+00> : vector<8x128xf32>
    %60 = tpu.matmul %59, %5, %cst_34 {dimension_numbers = #tpu.dot_dimension_numbers<[1], [0], [0], [1], [0, 0, 1, 1], [], []>} : vector<8x128xf32>, vector<128x128xf32>, vector<8x128xf32> -> vector<8x128xf32>
    %c4 = arith.constant 4 : index
    %c0_35 = arith.constant 0 : index
    %c0_36 = arith.constant 0 : index
    %61 = vector.load %arg1[%c4, %c0_35, %c0_36] : memref<16x8x128xf32, #tpu.memory_space<vmem>>, vector<1x8x128xf32>
    %62 = vector.shape_cast %61 : vector<1x8x128xf32> to vector<8x128xf32>
    %63 = arith.addf %62, %60 : vector<8x128xf32>
    %64 = arith.subf %63, %54 : vector<8x128xf32>
    %cst_37 = arith.constant 2.000000e-01 : f32
    %65 = vector.broadcast %cst_37 : f32 to vector<8x128xf32>
    %66 = arith.mulf %65, %64 : vector<8x128xf32>
    %67 = arith.addf %54, %66 : vector<8x128xf32>
    %c4_38 = arith.constant 4 : index
    %c0_39 = arith.constant 0 : index
    %c0_40 = arith.constant 0 : index
    %68 = vector.load %arg5[%c4_38, %c0_39, %c0_40] : memref<16x8x128xf32, #tpu.memory_space<vmem>>, vector<1x8x128xf32>
    %69 = vector.shape_cast %68 : vector<1x8x128xf32> to vector<8x128xf32>
    %70 = vector.shape_cast %67 : vector<8x128xf32> to vector<1x8x128xf32>
    tpu.vector_store %arg5[%c4_38, %c0_39, %c0_40], %70 {strides = array<i32>} : memref<16x8x128xf32, #tpu.memory_space<vmem>>, vector<1x8x128xf32>,
    %71 = arith.addf %67, %4 : vector<8x128xf32>
    %72 = math.tanh %71 : vector<8x128xf32>
    %cst_41 = arith.constant dense<0.000000e+00> : vector<8x128xf32>
    %73 = tpu.matmul %72, %5, %cst_41 {dimension_numbers = #tpu.dot_dimension_numbers<[1], [0], [0], [1], [0, 0, 1, 1], [], []>} : vector<8x128xf32>, vector<128x128xf32>, vector<8x128xf32> -> vector<8x128xf32>
    %c5 = arith.constant 5 : index
    %c0_42 = arith.constant 0 : index
    %c0_43 = arith.constant 0 : index
    %74 = vector.load %arg1[%c5, %c0_42, %c0_43] : memref<16x8x128xf32, #tpu.memory_space<vmem>>, vector<1x8x128xf32>
    %75 = vector.shape_cast %74 : vector<1x8x128xf32> to vector<8x128xf32>
    %76 = arith.addf %75, %73 : vector<8x128xf32>
    %77 = arith.subf %76, %67 : vector<8x128xf32>
    %cst_44 = arith.constant 2.000000e-01 : f32
    %78 = vector.broadcast %cst_44 : f32 to vector<8x128xf32>
    %79 = arith.mulf %78, %77 : vector<8x128xf32>
    %80 = arith.addf %67, %79 : vector<8x128xf32>
    %c5_45 = arith.constant 5 : index
    %c0_46 = arith.constant 0 : index
    %c0_47 = arith.constant 0 : index
    %81 = vector.load %arg5[%c5_45, %c0_46, %c0_47] : memref<16x8x128xf32, #tpu.memory_space<vmem>>, vector<1x8x128xf32>
    %82 = vector.shape_cast %81 : vector<1x8x128xf32> to vector<8x128xf32>
    %83 = vector.shape_cast %80 : vector<8x128xf32> to vector<1x8x128xf32>
    tpu.vector_store %arg5[%c5_45, %c0_46, %c0_47], %83 {strides = array<i32>} : memref<16x8x128xf32, #tpu.memory_space<vmem>>, vector<1x8x128xf32>,
    %84 = arith.addf %80, %4 : vector<8x128xf32>
    %85 = math.tanh %84 : vector<8x128xf32>
    %cst_48 = arith.constant dense<0.000000e+00> : vector<8x128xf32>
    %86 = tpu.matmul %85, %5, %cst_48 {dimension_numbers = #tpu.dot_dimension_numbers<[1], [0], [0], [1], [0, 0, 1, 1], [], []>} : vector<8x128xf32>, vector<128x128xf32>, vector<8x128xf32> -> vector<8x128xf32>
    %c6 = arith.constant 6 : index
    %c0_49 = arith.constant 0 : index
    %c0_50 = arith.constant 0 : index
    %87 = vector.load %arg1[%c6, %c0_49, %c0_50] : memref<16x8x128xf32, #tpu.memory_space<vmem>>, vector<1x8x128xf32>
    %88 = vector.shape_cast %87 : vector<1x8x128xf32> to vector<8x128xf32>
    %89 = arith.addf %88, %86 : vector<8x128xf32>
    %90 = arith.subf %89, %80 : vector<8x128xf32>
    %cst_51 = arith.constant 2.000000e-01 : f32
    %91 = vector.broadcast %cst_51 : f32 to vector<8x128xf32>
    %92 = arith.mulf %91, %90 : vector<8x128xf32>
    %93 = arith.addf %80, %92 : vector<8x128xf32>
    %c6_52 = arith.constant 6 : index
    %c0_53 = arith.constant 0 : index
    %c0_54 = arith.constant 0 : index
    %94 = vector.load %arg5[%c6_52, %c0_53, %c0_54] : memref<16x8x128xf32, #tpu.memory_space<vmem>>, vector<1x8x128xf32>
    %95 = vector.shape_cast %94 : vector<1x8x128xf32> to vector<8x128xf32>
    %96 = vector.shape_cast %93 : vector<8x128xf32> to vector<1x8x128xf32>
    tpu.vector_store %arg5[%c6_52, %c0_53, %c0_54], %96 {strides = array<i32>} : memref<16x8x128xf32, #tpu.memory_space<vmem>>, vector<1x8x128xf32>,
    %97 = arith.addf %93, %4 : vector<8x128xf32>
    %98 = math.tanh %97 : vector<8x128xf32>
    %cst_55 = arith.constant dense<0.000000e+00> : vector<8x128xf32>
    %99 = tpu.matmul %98, %5, %cst_55 {dimension_numbers = #tpu.dot_dimension_numbers<[1], [0], [0], [1], [0, 0, 1, 1], [], []>} : vector<8x128xf32>, vector<128x128xf32>, vector<8x128xf32> -> vector<8x128xf32>
    %c7 = arith.constant 7 : index
    %c0_56 = arith.constant 0 : index
    %c0_57 = arith.constant 0 : index
    %100 = vector.load %arg1[%c7, %c0_56, %c0_57] : memref<16x8x128xf32, #tpu.memory_space<vmem>>, vector<1x8x128xf32>
    %101 = vector.shape_cast %100 : vector<1x8x128xf32> to vector<8x128xf32>
    %102 = arith.addf %101, %99 : vector<8x128xf32>
    %103 = arith.subf %102, %93 : vector<8x128xf32>
    %cst_58 = arith.constant 2.000000e-01 : f32
    %104 = vector.broadcast %cst_58 : f32 to vector<8x128xf32>
    %105 = arith.mulf %104, %103 : vector<8x128xf32>
    %106 = arith.addf %93, %105 : vector<8x128xf32>
    %c7_59 = arith.constant 7 : index
    %c0_60 = arith.constant 0 : index
    %c0_61 = arith.constant 0 : index
    %107 = vector.load %arg5[%c7_59, %c0_60, %c0_61] : memref<16x8x128xf32, #tpu.memory_space<vmem>>, vector<1x8x128xf32>
    %108 = vector.shape_cast %107 : vector<1x8x128xf32> to vector<8x128xf32>
    %109 = vector.shape_cast %106 : vector<8x128xf32> to vector<1x8x128xf32>
    tpu.vector_store %arg5[%c7_59, %c0_60, %c0_61], %109 {strides = array<i32>} : memref<16x8x128xf32, #tpu.memory_space<vmem>>, vector<1x8x128xf32>,
    %110 = arith.addf %106, %4 : vector<8x128xf32>
    %111 = math.tanh %110 : vector<8x128xf32>
    %cst_62 = arith.constant dense<0.000000e+00> : vector<8x128xf32>
    %112 = tpu.matmul %111, %5, %cst_62 {dimension_numbers = #tpu.dot_dimension_numbers<[1], [0], [0], [1], [0, 0, 1, 1], [], []>} : vector<8x128xf32>, vector<128x128xf32>, vector<8x128xf32> -> vector<8x128xf32>
    %c8 = arith.constant 8 : index
    %c0_63 = arith.constant 0 : index
    %c0_64 = arith.constant 0 : index
    %113 = vector.load %arg1[%c8, %c0_63, %c0_64] : memref<16x8x128xf32, #tpu.memory_space<vmem>>, vector<1x8x128xf32>
    %114 = vector.shape_cast %113 : vector<1x8x128xf32> to vector<8x128xf32>
    %115 = arith.addf %114, %112 : vector<8x128xf32>
    %116 = arith.subf %115, %106 : vector<8x128xf32>
    %cst_65 = arith.constant 2.000000e-01 : f32
    %117 = vector.broadcast %cst_65 : f32 to vector<8x128xf32>
    %118 = arith.mulf %117, %116 : vector<8x128xf32>
    %119 = arith.addf %106, %118 : vector<8x128xf32>
    %c8_66 = arith.constant 8 : index
    %c0_67 = arith.constant 0 : index
    %c0_68 = arith.constant 0 : index
    %120 = vector.load %arg5[%c8_66, %c0_67, %c0_68] : memref<16x8x128xf32, #tpu.memory_space<vmem>>, vector<1x8x128xf32>
    %121 = vector.shape_cast %120 : vector<1x8x128xf32> to vector<8x128xf32>
    %122 = vector.shape_cast %119 : vector<8x128xf32> to vector<1x8x128xf32>
    tpu.vector_store %arg5[%c8_66, %c0_67, %c0_68], %122 {strides = array<i32>} : memref<16x8x128xf32, #tpu.memory_space<vmem>>, vector<1x8x128xf32>,
    %123 = arith.addf %119, %4 : vector<8x128xf32>
    %124 = math.tanh %123 : vector<8x128xf32>
    %cst_69 = arith.constant dense<0.000000e+00> : vector<8x128xf32>
    %125 = tpu.matmul %124, %5, %cst_69 {dimension_numbers = #tpu.dot_dimension_numbers<[1], [0], [0], [1], [0, 0, 1, 1], [], []>} : vector<8x128xf32>, vector<128x128xf32>, vector<8x128xf32> -> vector<8x128xf32>
    %c9 = arith.constant 9 : index
    %c0_70 = arith.constant 0 : index
    %c0_71 = arith.constant 0 : index
    %126 = vector.load %arg1[%c9, %c0_70, %c0_71] : memref<16x8x128xf32, #tpu.memory_space<vmem>>, vector<1x8x128xf32>
    %127 = vector.shape_cast %126 : vector<1x8x128xf32> to vector<8x128xf32>
    %128 = arith.addf %127, %125 : vector<8x128xf32>
    %129 = arith.subf %128, %119 : vector<8x128xf32>
    %cst_72 = arith.constant 2.000000e-01 : f32
    %130 = vector.broadcast %cst_72 : f32 to vector<8x128xf32>
    %131 = arith.mulf %130, %129 : vector<8x128xf32>
    %132 = arith.addf %119, %131 : vector<8x128xf32>
    %c9_73 = arith.constant 9 : index
    %c0_74 = arith.constant 0 : index
    %c0_75 = arith.constant 0 : index
    %133 = vector.load %arg5[%c9_73, %c0_74, %c0_75] : memref<16x8x128xf32, #tpu.memory_space<vmem>>, vector<1x8x128xf32>
    %134 = vector.shape_cast %133 : vector<1x8x128xf32> to vector<8x128xf32>
    %135 = vector.shape_cast %132 : vector<8x128xf32> to vector<1x8x128xf32>
    tpu.vector_store %arg5[%c9_73, %c0_74, %c0_75], %135 {strides = array<i32>} : memref<16x8x128xf32, #tpu.memory_space<vmem>>, vector<1x8x128xf32>,
    %136 = arith.addf %132, %4 : vector<8x128xf32>
    %137 = math.tanh %136 : vector<8x128xf32>
    %cst_76 = arith.constant dense<0.000000e+00> : vector<8x128xf32>
    %138 = tpu.matmul %137, %5, %cst_76 {dimension_numbers = #tpu.dot_dimension_numbers<[1], [0], [0], [1], [0, 0, 1, 1], [], []>} : vector<8x128xf32>, vector<128x128xf32>, vector<8x128xf32> -> vector<8x128xf32>
    %c10 = arith.constant 10 : index
    %c0_77 = arith.constant 0 : index
    %c0_78 = arith.constant 0 : index
    %139 = vector.load %arg1[%c10, %c0_77, %c0_78] : memref<16x8x128xf32, #tpu.memory_space<vmem>>, vector<1x8x128xf32>
    %140 = vector.shape_cast %139 : vector<1x8x128xf32> to vector<8x128xf32>
    %141 = arith.addf %140, %138 : vector<8x128xf32>
    %142 = arith.subf %141, %132 : vector<8x128xf32>
    %cst_79 = arith.constant 2.000000e-01 : f32
    %143 = vector.broadcast %cst_79 : f32 to vector<8x128xf32>
    %144 = arith.mulf %143, %142 : vector<8x128xf32>
    %145 = arith.addf %132, %144 : vector<8x128xf32>
    %c10_80 = arith.constant 10 : index
    %c0_81 = arith.constant 0 : index
    %c0_82 = arith.constant 0 : index
    %146 = vector.load %arg5[%c10_80, %c0_81, %c0_82] : memref<16x8x128xf32, #tpu.memory_space<vmem>>, vector<1x8x128xf32>
    %147 = vector.shape_cast %146 : vector<1x8x128xf32> to vector<8x128xf32>
    %148 = vector.shape_cast %145 : vector<8x128xf32> to vector<1x8x128xf32>
    tpu.vector_store %arg5[%c10_80, %c0_81, %c0_82], %148 {strides = array<i32>} : memref<16x8x128xf32, #tpu.memory_space<vmem>>, vector<1x8x128xf32>,
    %149 = arith.addf %145, %4 : vector<8x128xf32>
    %150 = math.tanh %149 : vector<8x128xf32>
    %cst_83 = arith.constant dense<0.000000e+00> : vector<8x128xf32>
    %151 = tpu.matmul %150, %5, %cst_83 {dimension_numbers = #tpu.dot_dimension_numbers<[1], [0], [0], [1], [0, 0, 1, 1], [], []>} : vector<8x128xf32>, vector<128x128xf32>, vector<8x128xf32> -> vector<8x128xf32>
    %c11 = arith.constant 11 : index
    %c0_84 = arith.constant 0 : index
    %c0_85 = arith.constant 0 : index
    %152 = vector.load %arg1[%c11, %c0_84, %c0_85] : memref<16x8x128xf32, #tpu.memory_space<vmem>>, vector<1x8x128xf32>
    %153 = vector.shape_cast %152 : vector<1x8x128xf32> to vector<8x128xf32>
    %154 = arith.addf %153, %151 : vector<8x128xf32>
    %155 = arith.subf %154, %145 : vector<8x128xf32>
    %cst_86 = arith.constant 2.000000e-01 : f32
    %156 = vector.broadcast %cst_86 : f32 to vector<8x128xf32>
    %157 = arith.mulf %156, %155 : vector<8x128xf32>
    %158 = arith.addf %145, %157 : vector<8x128xf32>
    %c11_87 = arith.constant 11 : index
    %c0_88 = arith.constant 0 : index
    %c0_89 = arith.constant 0 : index
    %159 = vector.load %arg5[%c11_87, %c0_88, %c0_89] : memref<16x8x128xf32, #tpu.memory_space<vmem>>, vector<1x8x128xf32>
    %160 = vector.shape_cast %159 : vector<1x8x128xf32> to vector<8x128xf32>
    %161 = vector.shape_cast %158 : vector<8x128xf32> to vector<1x8x128xf32>
    tpu.vector_store %arg5[%c11_87, %c0_88, %c0_89], %161 {strides = array<i32>} : memref<16x8x128xf32, #tpu.memory_space<vmem>>, vector<1x8x128xf32>,
    %162 = arith.addf %158, %4 : vector<8x128xf32>
    %163 = math.tanh %162 : vector<8x128xf32>
    %cst_90 = arith.constant dense<0.000000e+00> : vector<8x128xf32>
    %164 = tpu.matmul %163, %5, %cst_90 {dimension_numbers = #tpu.dot_dimension_numbers<[1], [0], [0], [1], [0, 0, 1, 1], [], []>} : vector<8x128xf32>, vector<128x128xf32>, vector<8x128xf32> -> vector<8x128xf32>
    %c12 = arith.constant 12 : index
    %c0_91 = arith.constant 0 : index
    %c0_92 = arith.constant 0 : index
    %165 = vector.load %arg1[%c12, %c0_91, %c0_92] : memref<16x8x128xf32, #tpu.memory_space<vmem>>, vector<1x8x128xf32>
    %166 = vector.shape_cast %165 : vector<1x8x128xf32> to vector<8x128xf32>
    %167 = arith.addf %166, %164 : vector<8x128xf32>
    %168 = arith.subf %167, %158 : vector<8x128xf32>
    %cst_93 = arith.constant 2.000000e-01 : f32
    %169 = vector.broadcast %cst_93 : f32 to vector<8x128xf32>
    %170 = arith.mulf %169, %168 : vector<8x128xf32>
    %171 = arith.addf %158, %170 : vector<8x128xf32>
    %c12_94 = arith.constant 12 : index
    %c0_95 = arith.constant 0 : index
    %c0_96 = arith.constant 0 : index
    %172 = vector.load %arg5[%c12_94, %c0_95, %c0_96] : memref<16x8x128xf32, #tpu.memory_space<vmem>>, vector<1x8x128xf32>
    %173 = vector.shape_cast %172 : vector<1x8x128xf32> to vector<8x128xf32>
    %174 = vector.shape_cast %171 : vector<8x128xf32> to vector<1x8x128xf32>
    tpu.vector_store %arg5[%c12_94, %c0_95, %c0_96], %174 {strides = array<i32>} : memref<16x8x128xf32, #tpu.memory_space<vmem>>, vector<1x8x128xf32>,
    %175 = arith.addf %171, %4 : vector<8x128xf32>
    %176 = math.tanh %175 : vector<8x128xf32>
    %cst_97 = arith.constant dense<0.000000e+00> : vector<8x128xf32>
    %177 = tpu.matmul %176, %5, %cst_97 {dimension_numbers = #tpu.dot_dimension_numbers<[1], [0], [0], [1], [0, 0, 1, 1], [], []>} : vector<8x128xf32>, vector<128x128xf32>, vector<8x128xf32> -> vector<8x128xf32>
    %c13 = arith.constant 13 : index
    %c0_98 = arith.constant 0 : index
    %c0_99 = arith.constant 0 : index
    %178 = vector.load %arg1[%c13, %c0_98, %c0_99] : memref<16x8x128xf32, #tpu.memory_space<vmem>>, vector<1x8x128xf32>
    %179 = vector.shape_cast %178 : vector<1x8x128xf32> to vector<8x128xf32>
    %180 = arith.addf %179, %177 : vector<8x128xf32>
    %181 = arith.subf %180, %171 : vector<8x128xf32>
    %cst_100 = arith.constant 2.000000e-01 : f32
    %182 = vector.broadcast %cst_100 : f32 to vector<8x128xf32>
    %183 = arith.mulf %182, %181 : vector<8x128xf32>
    %184 = arith.addf %171, %183 : vector<8x128xf32>
    %c13_101 = arith.constant 13 : index
    %c0_102 = arith.constant 0 : index
    %c0_103 = arith.constant 0 : index
    %185 = vector.load %arg5[%c13_101, %c0_102, %c0_103] : memref<16x8x128xf32, #tpu.memory_space<vmem>>, vector<1x8x128xf32>
    %186 = vector.shape_cast %185 : vector<1x8x128xf32> to vector<8x128xf32>
    %187 = vector.shape_cast %184 : vector<8x128xf32> to vector<1x8x128xf32>
    tpu.vector_store %arg5[%c13_101, %c0_102, %c0_103], %187 {strides = array<i32>} : memref<16x8x128xf32, #tpu.memory_space<vmem>>, vector<1x8x128xf32>,
    %188 = arith.addf %184, %4 : vector<8x128xf32>
    %189 = math.tanh %188 : vector<8x128xf32>
    %cst_104 = arith.constant dense<0.000000e+00> : vector<8x128xf32>
    %190 = tpu.matmul %189, %5, %cst_104 {dimension_numbers = #tpu.dot_dimension_numbers<[1], [0], [0], [1], [0, 0, 1, 1], [], []>} : vector<8x128xf32>, vector<128x128xf32>, vector<8x128xf32> -> vector<8x128xf32>
    %c14 = arith.constant 14 : index
    %c0_105 = arith.constant 0 : index
    %c0_106 = arith.constant 0 : index
    %191 = vector.load %arg1[%c14, %c0_105, %c0_106] : memref<16x8x128xf32, #tpu.memory_space<vmem>>, vector<1x8x128xf32>
    %192 = vector.shape_cast %191 : vector<1x8x128xf32> to vector<8x128xf32>
    %193 = arith.addf %192, %190 : vector<8x128xf32>
    %194 = arith.subf %193, %184 : vector<8x128xf32>
    %cst_107 = arith.constant 2.000000e-01 : f32
    %195 = vector.broadcast %cst_107 : f32 to vector<8x128xf32>
    %196 = arith.mulf %195, %194 : vector<8x128xf32>
    %197 = arith.addf %184, %196 : vector<8x128xf32>
    %c14_108 = arith.constant 14 : index
    %c0_109 = arith.constant 0 : index
    %c0_110 = arith.constant 0 : index
    %198 = vector.load %arg5[%c14_108, %c0_109, %c0_110] : memref<16x8x128xf32, #tpu.memory_space<vmem>>, vector<1x8x128xf32>
    %199 = vector.shape_cast %198 : vector<1x8x128xf32> to vector<8x128xf32>
    %200 = vector.shape_cast %197 : vector<8x128xf32> to vector<1x8x128xf32>
    tpu.vector_store %arg5[%c14_108, %c0_109, %c0_110], %200 {strides = array<i32>} : memref<16x8x128xf32, #tpu.memory_space<vmem>>, vector<1x8x128xf32>,
    %201 = arith.addf %197, %4 : vector<8x128xf32>
    %202 = math.tanh %201 : vector<8x128xf32>
    %cst_111 = arith.constant dense<0.000000e+00> : vector<8x128xf32>
    %203 = tpu.matmul %202, %5, %cst_111 {dimension_numbers = #tpu.dot_dimension_numbers<[1], [0], [0], [1], [0, 0, 1, 1], [], []>} : vector<8x128xf32>, vector<128x128xf32>, vector<8x128xf32> -> vector<8x128xf32>
    %c15 = arith.constant 15 : index
    %c0_112 = arith.constant 0 : index
    %c0_113 = arith.constant 0 : index
    %204 = vector.load %arg1[%c15, %c0_112, %c0_113] : memref<16x8x128xf32, #tpu.memory_space<vmem>>, vector<1x8x128xf32>
    %205 = vector.shape_cast %204 : vector<1x8x128xf32> to vector<8x128xf32>
    %206 = arith.addf %205, %203 : vector<8x128xf32>
    %207 = arith.subf %206, %197 : vector<8x128xf32>
    %cst_114 = arith.constant 2.000000e-01 : f32
    %208 = vector.broadcast %cst_114 : f32 to vector<8x128xf32>
    %209 = arith.mulf %208, %207 : vector<8x128xf32>
    %210 = arith.addf %197, %209 : vector<8x128xf32>
    %c15_115 = arith.constant 15 : index
    %c0_116 = arith.constant 0 : index
    %c0_117 = arith.constant 0 : index
    %211 = vector.load %arg5[%c15_115, %c0_116, %c0_117] : memref<16x8x128xf32, #tpu.memory_space<vmem>>, vector<1x8x128xf32>
    %212 = vector.shape_cast %211 : vector<1x8x128xf32> to vector<8x128xf32>
    %213 = vector.shape_cast %210 : vector<8x128xf32> to vector<1x8x128xf32>
    tpu.vector_store %arg5[%c15_115, %c0_116, %c0_117], %213 {strides = array<i32>} : memref<16x8x128xf32, #tpu.memory_space<vmem>>, vector<1x8x128xf32>,
    %c0_118 = arith.constant 0 : index
    %c0_119 = arith.constant 0 : index
    %214 = vector.load %arg6[%c0_118, %c0_119] : memref<8x128xf32, #tpu.memory_space<vmem>>, vector<8x128xf32>
    tpu.vector_store %arg6[%c0_118, %c0_119], %210 {strides = array<i32>} : memref<8x128xf32, #tpu.memory_space<vmem>>, vector<8x128xf32>,
    return
  }
  func.func @transform_0(%arg0: i32) -> (i32, i32, i32) {
    %c0_i32 = arith.constant 0 : i32
    %c0_i32_0 = arith.constant 0 : i32
    %c0_i32_1 = arith.constant 0 : i32
    return %arg0, %c0_i32, %c0_i32_0 : i32, i32, i32
  }
  func.func @transform_1(%arg0: i32) -> (i32, i32) {
    %c0_i32 = arith.constant 0 : i32
    %c0_i32_0 = arith.constant 0 : i32
    %c0_i32_1 = arith.constant 0 : i32
    return %c0_i32, %c0_i32_0 : i32, i32
  }
  func.func @transform_2(%arg0: i32) -> (i32, i32) {
    %c0_i32 = arith.constant 0 : i32
    %c0_i32_0 = arith.constant 0 : i32
    %c0_i32_1 = arith.constant 0 : i32
    return %c0_i32, %c0_i32_0 : i32, i32
  }
  func.func @transform_3(%arg0: i32) -> (i32, i32) {
    %c0_i32 = arith.constant 0 : i32
    %c0_i32_0 = arith.constant 0 : i32
    %c0_i32_1 = arith.constant 0 : i32
    return %c0_i32, %c0_i32_0 : i32, i32
  }
  func.func @transform_4(%arg0: i32) -> (i32, i32, i32) {
    %c0_i32 = arith.constant 0 : i32
    %c0_i32_0 = arith.constant 0 : i32
    %c0_i32_1 = arith.constant 0 : i32
    return %arg0, %c0_i32, %c0_i32_0 : i32, i32, i32
  }
}

</mosaic_0001>

<bundles_post_ra>
// kernel: tpu_custom_call.1
= control target key start
LH: loop header
LB: loop body
LE: loop exit
PB: predicated region body
PF: predicated region fallthrough
CT: control target
= control target key end

     0   :  { %9 = vsyncpa [#allocation4], 0  ;;  %s3152_s0 = inlined_call_operand.hbm [shape: f32[16,8,128], index: 0, kind: input, shape index: {}]   ;;  %s3153_s1 = inlined_call_operand.hbm [shape: f32[8,128], index: 1, kind: input, shape index: {}]   ;;  %s3154_s2 = inlined_call_operand.hbm [shape: f32[128,128], index: 2, kind: input, shape index: {}]   ;;  %s3155_s3 = inlined_call_operand.vmem [shape: f32[8,128], index: 3, kind: input, shape index: {}]   ;;  %s3156_s4 = inlined_call_operand.hbm [shape: f32[16,8,128], index: 4, kind: output, shape index: {}]  }
   0x1   :  { %10 = vsyncpa [#allocation7], 0 }
   0x2   :  { %11 = vsyncpa [#allocation5], 0  ;;  %s2729_s15 = smov [#allocation6]   ;;  %s2730_s17 = smov [#allocation3]  }
   0x3   :  { %s30_s16 = sshll.u32 %s2729_s15, 4  ;;  %s17_s18 = sshll.u32 %s2730_s17, 4  ;;  %s31_s16 = int_to_ptr.vmem [resolvable:$true] %s30_s16  ;;  %s2763_s18 = int_to_ptr.vmem [resolvable:$true] %s17_s18 }
   0x4   :  { %s2635_s21 = scalar_lea.hbm %s3153_s1, 128 }
   0x5   :  { %p2636_p0 = scmp.ne.s32.totalorder %s3153_s1, %s2635_s21  ;;  %p2639_p1 = scmp.lt.u32.totalorder %s2635_s21, %s3153_s1 }
   0x7   :  { %p2641_p2 = pnand %p2639_p1, %p2636_p0 }
   0x9   :  { %2644 = shalt.err (!%p2641_p2)
}
   0xa   :  { %s2645_s26 = scalar_lea.vmem %s31_s16, 128  ;;  %p2650_p4 = scmp.lt.s32.totalorder %s31_s16, %s31_s16 }
   0xb   :  { %p2646_p3 = scmp.ne.s32.totalorder %s31_s16, %s2645_s26  ;;  %p2651_p5 = scmp.lt.s32.totalorder %s2645_s26, %s2645_s26 }
   0xd   :  { %p2652_p6 = por %p2651_p5, %p2650_p4 }
   0xf   :  { %p2653_p7 = pnand %p2652_p6, %p2646_p3 }
  0x11   :  { %2656 = shalt.err (!%p2653_p7)
}
  0x12   :  { %33 = dma.hbm_to_vmem [thread:$0]  %s3153_s1, 128, %s31_s16, [#allocation7]  }
  0x13   :  { %s2657_s5 = scalar_lea.hbm %s3152_s0, 2048 }
  0x14   :  { %p2658_p8 = scmp.ne.s32.totalorder %s3152_s0, %s2657_s5  ;;  %p2661_p9 = scmp.lt.u32.totalorder %s2657_s5, %s3152_s0 }
  0x16   :  { %p2663_p10 = pnand %p2661_p9, %p2658_p8 }
  0x18   :  { %2666 = shalt.err (!%p2663_p10)
}
  0x19   :  { %s2667_s10 = scalar_lea.vmem %s2763_s18, 2048  ;;  %p2672_p12 = scmp.lt.s32.totalorder %s2763_s18, %s2763_s18 }
  0x1a   :  { %p2668_p11 = scmp.ne.s32.totalorder %s2763_s18, %s2667_s10  ;;  %p2673_p13 = scmp.lt.s32.totalorder %s2667_s10, %s2667_s10 }
  0x1c   :  { %p2674_p0 = por %p2673_p13, %p2672_p12 }
  0x1e   :  { %p2675_p1 = pnand %p2674_p0, %p2668_p11 }
  0x20   :  { %2678 = shalt.err (!%p2675_p1)
}
  0x21   :  { %s2731_s1 = smov 128   ;;  %s2732_s11 = smov 8  }
  0x22   :  { %23 = dma.hbm_to_vmem [thread:$0]  %s3152_s0, 2048, %s2763_s18, [#allocation4], %s2731_s1, %s2731_s1, %s2732_s11  }
  0x23   :  { %s2733_s14 = smov [#allocation8]   ;;  %s2679_s19 = scalar_lea.hbm %s3154_s2, 2048 }
  0x24   :  { %s39_s15 = sshll.u32 %s2733_s14, 4  ;;  %p2680_p2 = scmp.ne.s32.totalorder %s3154_s2, %s2679_s19  ;;  %s40_s15 = int_to_ptr.vmem [resolvable:$true] %s39_s15 }
  0x25   :  { %p2683_p3 = scmp.lt.u32.totalorder %s2679_s19, %s3154_s2 }
  0x27   :  { %p2685_p4 = pnand %p2683_p3, %p2680_p2 }
  0x29   :  { %2688 = shalt.err (!%p2685_p4)
}
  0x2a   :  { %s2689_s24 = scalar_lea.vmem %s40_s15, 2048  ;;  %p2694_p6 = scmp.lt.s32.totalorder %s40_s15, %s40_s15 }
  0x2b   :  { %p2690_p5 = scmp.ne.s32.totalorder %s40_s15, %s2689_s24  ;;  %p2695_p7 = scmp.lt.s32.totalorder %s2689_s24, %s2689_s24 }
  0x2d   :  { %p2696_p8 = por %p2695_p7, %p2694_p6 }
  0x2f   :  { %p2697_p9 = pnand %p2696_p8, %p2690_p5 }
  0x31   :  { %2700 = shalt.err (!%p2697_p9)
}
  0x32   :  { %45 = dma.hbm_to_vmem [thread:$0]  %s3154_s2, 2048, %s40_s15, [#allocation7], %s2731_s1, %s2731_s1, %s2732_s11  }
  0x33   :  { %2723 = dma.done.wait [#allocation4], 2048  }
  0x34   :  { %2724 = vsyncadd [#allocation4], 4294965248 }
  0x35   :  { %2725 = dma.done.wait [#allocation7], 2176  }
  0x36   :  { %2726 = vsyncadd [#allocation7], 4294965120  ;;  %v2734_v0 = vmov 0.0|0.0   ;;  %vm2735_vm0 = vmmov 0   ;;  %v2736_v1 = vmov 0.0   ;;  %v65_v2 = vld [vmem:[#allocation8] sm:$0xff] }
  0x37   :  { %2210 = vmatprep.subr.bf16.mxu0 %v2734_v0  ;;  %1682 = vmatprep.mubr.msk.f32.mxu0 %vm2735_vm0, %v2736_v1  ;;  %v66_v3 = vld [vmem:[#allocation8 + $0x8] sm:$0xff]  ;;  %v67_v4 = vld [vmem:[#allocation8 + $0x10] sm:$0xff]  ;;  %v68_v6 = vld [vmem:[#allocation8 + $0x18] sm:$0xff] }
  0x38   :  { %2234 = vmatprep.subr.bf16.mxu1 %v2734_v0  ;;  %1717 = vmatprep.mubr.msk.f32.mxu1 %vm2735_vm0, %v2736_v1  ;;  %v2818_v5 = vpack.c.bf16 %v66_v3, %v65_v2  ;;  %v2821_v7 = vpack.c.bf16 %v68_v6, %v67_v4  ;;  %v69_v8 = vld [vmem:[#allocation8 + $0x20] sm:$0xff]  ;;  %v70_v9 = vld [vmem:[#allocation8 + $0x28] sm:$0xff]  ;;  %v71_v11 = vld [vmem:[#allocation8 + $0x30] sm:$0xff] }
  0x39   :  { %v2827_v10 = vpack.c.bf16 %v70_v9, %v69_v8  ;;  %v72_v12 = vld [vmem:[#allocation8 + $0x38] sm:$0xff]  ;;  %v73_v14 = vld [vmem:[#allocation8 + $0x40] sm:$0xff]  ;;  %v74_v15 = vld [vmem:[#allocation8 + $0x48] sm:$0xff] }
  0x3a   :  { %2212 = vmatpush3.bf16.msra.mxu0 %v2818_v5  ;;  %2236 = vmatpush3.bf16.msra.mxu1 %v2818_v5  ;;  %v2833_v13 = vpack.c.bf16 %v72_v12, %v71_v11  ;;  %v61_v16 = vld [vmem:[#allocation6] sm:$0xff]  ;;  %v2844_v18 = vpack.c.bf16 %v74_v15, %v73_v14  ;;  %v75_v19 = vld [vmem:[#allocation8 + $0x50] sm:$0xff]  ;;  %v77_v23 = vld [vmem:[#allocation8 + $0x60] sm:$0xff] }
  0x3b   :  { %2213 = vmatprep.subr.bf16.mxu0 %v2734_v0  ;;  %2237 = vmatprep.subr.bf16.mxu1 %v2734_v0  ;;  %v2841_v17 = vld [vmem:[%s3155_s3] sm:$0xff]  ;;  %v78_v24 = vld [vmem:[#allocation8 + $0x68] sm:$0xff]  ;;  %v79_v26 = vld [vmem:[#allocation8 + $0x70] sm:$0xff]  ;;  %s2737_s3 = smov [#allocation9]  }
  0x3c   :  { %v76_v20 = vld [vmem:[#allocation8 + $0x58] sm:$0xff]  ;;  %v81_v21 = vadd.f32 %v2841_v17, %v61_v16  ;;  %v2857_v25 = vpack.c.bf16 %v78_v24, %v77_v23  ;;  %v232_v39 = vld [vmem:[#allocation3 + $0x8] sm:$0xff]  ;;  %v312_v48 = vld [vmem:[#allocation3 + $0x10] sm:$0xff]  ;;  %s1365_s26 = sshll.u32 %s2737_s3, 4  ;;  %s1366_s26 = int_to_ptr.vmem [resolvable:$true] %s1365_s26 }
  0x3d   :  { %v2851_v22 = vpack.c.bf16 %v76_v20, %v75_v19  ;;  %v80_v27 = vld [vmem:[#allocation8 + $0x78] sm:$0xff]  ;;  %v392_v57 = vld [vmem:[#allocation3 + $0x18] sm:$0xff]  ;;  %v552_v19 = vld [vmem:[#allocation3 + $0x28] sm:$0xff]  ;;  %s2701_s27 = scalar_lea.vmem %s1366_s26, 2048  ;;  %p2706_p11 = scmp.lt.s32.totalorder %s1366_s26, %s1366_s26 }
  0x3e   :  { %2215 = vmatpush3.bf16.msra.mxu0 %v2821_v7  ;;  %2239 = vmatpush3.bf16.msra.mxu1 %v2821_v7  ;;  %2603 = vtanh.f32 %v81_v21  ;;  %v2863_v28 = vpack.c.bf16 %v80_v27, %v79_v26  ;;  %v153_v30 = vld [vmem:[#allocation3] sm:$0xff]  ;;  %p2702_p10 = scmp.ne.s32.totalorder %s1366_s26, %s2701_s27  ;;  %p2707_p12 = scmp.lt.s32.totalorder %s2701_s27, %s2701_s27 }
  0x3f   :  { %2216 = vmatprep.subr.bf16.mxu0 %v2734_v0  ;;  %2240 = vmatprep.subr.bf16.mxu1 %v2734_v0  ;;  %v472_v4 = vld [vmem:[#allocation3 + $0x20] sm:$0xff] }
  0x40   :  { %p2708_p13 = por %p2707_p12, %p2706_p11 }
  0x42   :  { %2218 = vmatpush3.bf16.msra.mxu0 %v2827_v10  ;;  %2242 = vmatpush3.bf16.msra.mxu1 %v2827_v10  ;;  %p2709_p0 = pnand %p2708_p13, %p2702_p10 }
  0x43   :  { %2219 = vmatprep.subr.bf16.mxu0 %v2734_v0  ;;  %2243 = vmatprep.subr.bf16.mxu1 %v2734_v0 }
  0x46   :  { %2221 = vmatpush3.bf16.msra.mxu0 %v2833_v13  ;;  %2245 = vmatpush3.bf16.msra.mxu1 %v2833_v13 }
  0x47   :  { %2222 = vmatprep.subr.bf16.mxu0 %v2734_v0  ;;  %2246 = vmatprep.subr.bf16.mxu1 %v2734_v0 }
  0x48   :  { %v2604_v29 = vpop.eup %2603 }
  0x4a   :  { %2224 = vmatpush3.bf16.msra.mxu0 %v2844_v18  ;;  %2248 = vmatpush3.bf16.msra.mxu1 %v2844_v18 }
  0x4b   :  { %2225 = vmatprep.subr.bf16.mxu0 %v2734_v0  ;;  %2249 = vmatprep.subr.bf16.mxu1 %v2734_v0 }
  0x4e   :  { %2227 = vmatpush3.bf16.msra.mxu0 %v2851_v22  ;;  %2251 = vmatpush3.bf16.msra.mxu1 %v2851_v22 }
  0x4f   :  { %2228 = vmatprep.subr.bf16.mxu0 %v2734_v0  ;;  %2252 = vmatprep.subr.bf16.mxu1 %v2734_v0 }
  0x52   :  { %2230 = vmatpush3.bf16.msra.mxu0 %v2857_v25  ;;  %2254 = vmatpush3.bf16.msra.mxu1 %v2857_v25 }
  0x53   :  { %2231 = vmatprep.subr.bf16.mxu0 %v2734_v0  ;;  %2255 = vmatprep.subr.bf16.mxu1 %v2734_v0 }
  0x56   :  { %2233 = vmatpush3.bf16.msra.mxu0 %v2863_v28  ;;  %2257 = vmatpush3.bf16.msra.mxu1 %v2863_v28 }
  0x57   :  { %2258 = vmatprep.subr.bf16.mxu0 %v2734_v0  ;;  %2282 = vmatprep.subr.bf16.mxu1 %v2734_v0 }
  0x59   :  { %1683 = vmatmul.mubr.f32.vlgmr.msra.gmra.mrb[0].mxu0 %v2604_v29 }
  0x5a   :  { %2260 = vmatpush3.bf16.msra.mxu0 %v2818_v5  ;;  %1752 = vmatprep.mubr.msk.f32.mxu0 %vm2735_vm0, %v2736_v1 }
  0x5b   :  { %2261 = vmatprep.subr.bf16.mxu0 %v2734_v0 }
  0x5e   :  { %2263 = vmatpush3.bf16.msra.mxu0 %v2821_v7 }
  0x5f   :  { %2264 = vmatprep.subr.bf16.mxu0 %v2734_v0 }
  0x62   :  { %2266 = vmatpush3.bf16.msra.mxu0 %v2827_v10 }
  0x63   :  { %2267 = vmatprep.subr.bf16.mxu0 %v2734_v0 }
  0x66   :  { %2269 = vmatpush3.bf16.msra.mxu0 %v2833_v13 }
  0x67   :  { %2270 = vmatprep.subr.bf16.mxu0 %v2734_v0 }
  0x6a   :  { %2272 = vmatpush3.bf16.msra.mxu0 %v2844_v18 }
  0x6b   :  { %2273 = vmatprep.subr.bf16.mxu0 %v2734_v0 }
  0x6e   :  { %2275 = vmatpush3.bf16.msra.mxu0 %v2851_v22 }
  0x6f   :  { %2276 = vmatprep.subr.bf16.mxu0 %v2734_v0 }
  0x72   :  { %2278 = vmatpush3.bf16.msra.mxu0 %v2857_v25 }
  0x73   :  { %2279 = vmatprep.subr.bf16.mxu0 %v2734_v0 }
  0x76   :  { %2281 = vmatpush3.bf16.msra.mxu0 %v2863_v28 }
  0x77   :  { %2306 = vmatprep.subr.bf16.mxu0 %v2734_v0 }
 0x12c   :  { %v149_v31 = vpop.f32.mrb[0].mxu0 }
 0x12d   :  { %v154_v32 = vadd.f32 %v153_v30, %v149_v31  ;;  %v1684_v33 = vpop.f32.mrb[1].mxu0  ;;  %v632_v31 = vld [vmem:[#allocation3 + $0x30] sm:$0xff] }
 0x12f   :  { %v155_v34 = vsub.f32 %v154_v32, %v61_v16 }
 0x131   :  { %v156_v35 = vmul.f32 0.2, %v155_v34 }
 0x133   :  { %v157_v36 = vadd.f32 %v156_v35, %v61_v16 }
 0x135   :  { %158 = vst [vmem:[#allocation9] sm:$0xff] %v157_v36  ;;  %v159_v37 = vadd.f32 %v157_v36, %v2841_v17 }
 0x137   :  { %2605 = vtanh.f32 %v159_v37 }
 0x141   :  { %v2606_v38 = vpop.eup %2605 }
 0x142   :  { %1718 = vmatmul.mubr.f32.vlgmr.msra.gmra.mrb[0].mxu1 %v2606_v38 }
 0x143   :  { %2284 = vmatpush3.bf16.msra.mxu1 %v2818_v5  ;;  %1787 = vmatprep.mubr.msk.f32.mxu1 %vm2735_vm0, %v2736_v1 }
 0x144   :  { %2285 = vmatprep.subr.bf16.mxu1 %v2734_v0 }
 0x147   :  { %2287 = vmatpush3.bf16.msra.mxu1 %v2821_v7 }
 0x148   :  { %2288 = vmatprep.subr.bf16.mxu1 %v2734_v0 }
 0x14b   :  { %2290 = vmatpush3.bf16.msra.mxu1 %v2827_v10 }
 0x14c   :  { %2291 = vmatprep.subr.bf16.mxu1 %v2734_v0 }
 0x14f   :  { %2293 = vmatpush3.bf16.msra.mxu1 %v2833_v13 }
 0x150   :  { %2294 = vmatprep.subr.bf16.mxu1 %v2734_v0 }
 0x153   :  { %2296 = vmatpush3.bf16.msra.mxu1 %v2844_v18 }
 0x154   :  { %2297 = vmatprep.subr.bf16.mxu1 %v2734_v0 }
 0x157   :  { %2299 = vmatpush3.bf16.msra.mxu1 %v2851_v22 }
 0x158   :  { %2300 = vmatprep.subr.bf16.mxu1 %v2734_v0 }
 0x15b   :  { %2302 = vmatpush3.bf16.msra.mxu1 %v2857_v25 }
 0x15c   :  { %2303 = vmatprep.subr.bf16.mxu1 %v2734_v0 }
 0x15f   :  { %2305 = vmatpush3.bf16.msra.mxu1 %v2863_v28 }
 0x160   :  { %2330 = vmatprep.subr.bf16.mxu1 %v2734_v0 }
 0x215   :  { %v227_v40 = vpop.f32.mrb[0].mxu1 }
 0x216   :  { %v233_v41 = vadd.f32 %v232_v39, %v227_v40  ;;  %v1719_v42 = vpop.f32.mrb[1].mxu1  ;;  %v712_v40 = vld [vmem:[#allocation3 + $0x38] sm:$0xff] }
 0x218   :  { %v234_v43 = vsub.f32 %v233_v41, %v157_v36 }
 0x21a   :  { %v235_v44 = vmul.f32 0.2, %v234_v43 }
 0x21c   :  { %v236_v45 = vadd.f32 %v235_v44, %v157_v36 }
 0x21e   :  { %238 = vst [vmem:[#allocation9 + $0x8] sm:$0xff] %v236_v45  ;;  %v239_v46 = vadd.f32 %v236_v45, %v2841_v17 }
 0x220   :  { %2607 = vtanh.f32 %v239_v46 }
 0x22a   :  { %v2608_v47 = vpop.eup %2607 }
 0x22b   :  { %1753 = vmatmul.mubr.f32.vlgmr.msra.gmra.mrb[2].mxu0 %v2608_v47 }
 0x22c   :  { %2308 = vmatpush3.bf16.msra.mxu0 %v2818_v5  ;;  %1822 = vmatprep.mubr.msk.f32.mxu0 %vm2735_vm0, %v2736_v1 }
 0x22d   :  { %2309 = vmatprep.subr.bf16.mxu0 %v2734_v0 }
 0x230   :  { %2311 = vmatpush3.bf16.msra.mxu0 %v2821_v7 }
 0x231   :  { %2312 = vmatprep.subr.bf16.mxu0 %v2734_v0 }
 0x234   :  { %2314 = vmatpush3.bf16.msra.mxu0 %v2827_v10 }
 0x235   :  { %2315 = vmatprep.subr.bf16.mxu0 %v2734_v0 }
 0x238   :  { %2317 = vmatpush3.bf16.msra.mxu0 %v2833_v13 }
 0x239   :  { %2318 = vmatprep.subr.bf16.mxu0 %v2734_v0 }
 0x23c   :  { %2320 = vmatpush3.bf16.msra.mxu0 %v2844_v18 }
 0x23d   :  { %2321 = vmatprep.subr.bf16.mxu0 %v2734_v0 }
 0x240   :  { %2323 = vmatpush3.bf16.msra.mxu0 %v2851_v22 }
 0x241   :  { %2324 = vmatprep.subr.bf16.mxu0 %v2734_v0 }
 0x244   :  { %2326 = vmatpush3.bf16.msra.mxu0 %v2857_v25 }
 0x245   :  { %2327 = vmatprep.subr.bf16.mxu0 %v2734_v0 }
 0x248   :  { %2329 = vmatpush3.bf16.msra.mxu0 %v2863_v28 }
 0x249   :  { %2354 = vmatprep.subr.bf16.mxu0 %v2734_v0 }
 0x2fe   :  { %v307_v49 = vpop.f32.mrb[2].mxu0 }
 0x2ff   :  { %v313_v50 = vadd.f32 %v312_v48, %v307_v49  ;;  %v1754_v51 = vpop.f32.mrb[3].mxu0  ;;  %v792_v49 = vld [vmem:[#allocation3 + $0x40] sm:$0xff] }
 0x301   :  { %v314_v52 = vsub.f32 %v313_v50, %v236_v45 }
 0x303   :  { %v315_v53 = vmul.f32 0.2, %v314_v52 }
 0x305   :  { %v316_v54 = vadd.f32 %v315_v53, %v236_v45 }
 0x307   :  { %318 = vst [vmem:[#allocation9 + $0x10] sm:$0xff] %v316_v54  ;;  %v319_v55 = vadd.f32 %v316_v54, %v2841_v17 }
 0x309   :  { %2609 = vtanh.f32 %v319_v55 }
 0x313   :  { %v2610_v56 = vpop.eup %2609 }
 0x314   :  { %1788 = vmatmul.mubr.f32.vlgmr.msra.gmra.mrb[2].mxu1 %v2610_v56 }
 0x315   :  { %2332 = vmatpush3.bf16.msra.mxu1 %v2818_v5  ;;  %1857 = vmatprep.mubr.msk.f32.mxu1 %vm2735_vm0, %v2736_v1 }
 0x316   :  { %2333 = vmatprep.subr.bf16.mxu1 %v2734_v0 }
 0x319   :  { %2335 = vmatpush3.bf16.msra.mxu1 %v2821_v7 }
 0x31a   :  { %2336 = vmatprep.subr.bf16.mxu1 %v2734_v0 }
 0x31d   :  { %2338 = vmatpush3.bf16.msra.mxu1 %v2827_v10 }
 0x31e   :  { %2339 = vmatprep.subr.bf16.mxu1 %v2734_v0 }
 0x321   :  { %2341 = vmatpush3.bf16.msra.mxu1 %v2833_v13 }
 0x322   :  { %2342 = vmatprep.subr.bf16.mxu1 %v2734_v0 }
 0x325   :  { %2344 = vmatpush3.bf16.msra.mxu1 %v2844_v18 }
 0x326   :  { %2345 = vmatprep.subr.bf16.mxu1 %v2734_v0 }
 0x329   :  { %2347 = vmatpush3.bf16.msra.mxu1 %v2851_v22 }
 0x32a   :  { %2348 = vmatprep.subr.bf16.mxu1 %v2734_v0 }
 0x32d   :  { %2350 = vmatpush3.bf16.msra.mxu1 %v2857_v25 }
 0x32e   :  { %2351 = vmatprep.subr.bf16.mxu1 %v2734_v0 }
 0x331   :  { %2353 = vmatpush3.bf16.msra.mxu1 %v2863_v28 }
 0x332   :  { %2378 = vmatprep.subr.bf16.mxu1 %v2734_v0 }
 0x3e7   :  { %v387_v58 = vpop.f32.mrb[2].mxu1 }
 0x3e8   :  { %v393_v59 = vadd.f32 %v392_v57, %v387_v58  ;;  %v1789_v60 = vpop.f32.mrb[3].mxu1  ;;  %v872_v58 = vld [vmem:[#allocation3 + $0x48] sm:$0xff] }
 0x3ea   :  { %v394_v61 = vsub.f32 %v393_v59, %v316_v54 }
 0x3ec   :  { %v395_v62 = vmul.f32 0.2, %v394_v61 }
 0x3ee   :  { %v396_v63 = vadd.f32 %v395_v62, %v316_v54 }
 0x3f0   :  { %398 = vst [vmem:[#allocation9 + $0x18] sm:$0xff] %v396_v63  ;;  %v399_v2 = vadd.f32 %v396_v63, %v2841_v17 }
 0x3f2   :  { %2611 = vtanh.f32 %v399_v2 }
 0x3fc   :  { %v2612_v3 = vpop.eup %2611 }
 0x3fd   :  { %1823 = vmatmul.mubr.f32.vlgmr.msra.gmra.mrb[4].mxu0 %v2612_v3 }
 0x3fe   :  { %2356 = vmatpush3.bf16.msra.mxu0 %v2818_v5  ;;  %1892 = vmatprep.mubr.msk.f32.mxu0 %vm2735_vm0, %v2736_v1 }
 0x3ff   :  { %2357 = vmatprep.subr.bf16.mxu0 %v2734_v0 }
 0x402   :  { %2359 = vmatpush3.bf16.msra.mxu0 %v2821_v7 }
 0x403   :  { %2360 = vmatprep.subr.bf16.mxu0 %v2734_v0 }
 0x406   :  { %2362 = vmatpush3.bf16.msra.mxu0 %v2827_v10 }
 0x407   :  { %2363 = vmatprep.subr.bf16.mxu0 %v2734_v0 }
 0x40a   :  { %2365 = vmatpush3.bf16.msra.mxu0 %v2833_v13 }
 0x40b   :  { %2366 = vmatprep.subr.bf16.mxu0 %v2734_v0 }
 0x40e   :  { %2368 = vmatpush3.bf16.msra.mxu0 %v2844_v18 }
 0x40f   :  { %2369 = vmatprep.subr.bf16.mxu0 %v2734_v0 }
 0x412   :  { %2371 = vmatpush3.bf16.msra.mxu0 %v2851_v22 }
 0x413   :  { %2372 = vmatprep.subr.bf16.mxu0 %v2734_v0 }
 0x416   :  { %2374 = vmatpush3.bf16.msra.mxu0 %v2857_v25 }
 0x417   :  { %2375 = vmatprep.subr.bf16.mxu0 %v2734_v0 }
 0x41a   :  { %2377 = vmatpush3.bf16.msra.mxu0 %v2863_v28 }
 0x41b   :  { %2402 = vmatprep.subr.bf16.mxu0 %v2734_v0 }
 0x4d0   :  { %v467_v6 = vpop.f32.mrb[4].mxu0 }
 0x4d1   :  { %v473_v8 = vadd.f32 %v472_v4, %v467_v6  ;;  %v1824_v9 = vpop.f32.mrb[5].mxu0  ;;  %v952_v6 = vld [vmem:[#allocation3 + $0x50] sm:$0xff] }
 0x4d3   :  { %v474_v11 = vsub.f32 %v473_v8, %v396_v63 }
 0x4d5   :  { %v475_v12 = vmul.f32 0.2, %v474_v11 }
 0x4d7   :  { %v476_v14 = vadd.f32 %v475_v12, %v396_v63 }
 0x4d9   :  { %478 = vst [vmem:[#allocation9 + $0x20] sm:$0xff] %v476_v14  ;;  %v479_v15 = vadd.f32 %v476_v14, %v2841_v17 }
 0x4db   :  { %2613 = vtanh.f32 %v479_v15 }
 0x4e5   :  { %v2614_v16 = vpop.eup %2613 }
 0x4e6   :  { %1858 = vmatmul.mubr.f32.vlgmr.msra.gmra.mrb[4].mxu1 %v2614_v16 }
 0x4e7   :  { %2380 = vmatpush3.bf16.msra.mxu1 %v2818_v5  ;;  %1927 = vmatprep.mubr.msk.f32.mxu1 %vm2735_vm0, %v2736_v1 }
 0x4e8   :  { %2381 = vmatprep.subr.bf16.mxu1 %v2734_v0 }
 0x4eb   :  { %2383 = vmatpush3.bf16.msra.mxu1 %v2821_v7 }
 0x4ec   :  { %2384 = vmatprep.subr.bf16.mxu1 %v2734_v0 }
 0x4ef   :  { %2386 = vmatpush3.bf16.msra.mxu1 %v2827_v10 }
 0x4f0   :  { %2387 = vmatprep.subr.bf16.mxu1 %v2734_v0 }
 0x4f3   :  { %2389 = vmatpush3.bf16.msra.mxu1 %v2833_v13 }
 0x4f4   :  { %2390 = vmatprep.subr.bf16.mxu1 %v2734_v0 }
 0x4f7   :  { %2392 = vmatpush3.bf16.msra.mxu1 %v2844_v18 }
 0x4f8   :  { %2393 = vmatprep.subr.bf16.mxu1 %v2734_v0 }
 0x4fb   :  { %2395 = vmatpush3.bf16.msra.mxu1 %v2851_v22 }
 0x4fc   :  { %2396 = vmatprep.subr.bf16.mxu1 %v2734_v0 }
 0x4ff   :  { %2398 = vmatpush3.bf16.msra.mxu1 %v2857_v25 }
 0x500   :  { %2399 = vmatprep.subr.bf16.mxu1 %v2734_v0 }
 0x503   :  { %2401 = vmatpush3.bf16.msra.mxu1 %v2863_v28 }
 0x504   :  { %2426 = vmatprep.subr.bf16.mxu1 %v2734_v0 }
 0x5b9   :  { %v547_v20 = vpop.f32.mrb[4].mxu1 }
 0x5ba   :  { %v553_v21 = vadd.f32 %v552_v19, %v547_v20  ;;  %v1859_v23 = vpop.f32.mrb[5].mxu1  ;;  %v1032_v20 = vld [vmem:[#allocation3 + $0x58] sm:$0xff] }
 0x5bc   :  { %v554_v24 = vsub.f32 %v553_v21, %v476_v14 }
 0x5be   :  { %v555_v26 = vmul.f32 0.2, %v554_v24 }
 0x5c0   :  { %v556_v27 = vadd.f32 %v555_v26, %v476_v14 }
 0x5c2   :  { %558 = vst [vmem:[#allocation9 + $0x28] sm:$0xff] %v556_v27  ;;  %v559_v29 = vadd.f32 %v556_v27, %v2841_v17 }
 0x5c4   :  { %2615 = vtanh.f32 %v559_v29 }
 0x5ce   :  { %v2616_v30 = vpop.eup %2615 }
 0x5cf   :  { %1893 = vmatmul.mubr.f32.vlgmr.msra.gmra.mrb[6].mxu0 %v2616_v30 }
 0x5d0   :  { %2404 = vmatpush3.bf16.msra.mxu0 %v2818_v5  ;;  %1962 = vmatprep.mubr.msk.f32.mxu0 %vm2735_vm0, %v2736_v1 }
 0x5d1   :  { %2405 = vmatprep.subr.bf16.mxu0 %v2734_v0 }
 0x5d4   :  { %2407 = vmatpush3.bf16.msra.mxu0 %v2821_v7 }
 0x5d5   :  { %2408 = vmatprep.subr.bf16.mxu0 %v2734_v0 }
 0x5d8   :  { %2410 = vmatpush3.bf16.msra.mxu0 %v2827_v10 }
 0x5d9   :  { %2411 = vmatprep.subr.bf16.mxu0 %v2734_v0 }
 0x5dc   :  { %2413 = vmatpush3.bf16.msra.mxu0 %v2833_v13 }
 0x5dd   :  { %2414 = vmatprep.subr.bf16.mxu0 %v2734_v0 }
 0x5e0   :  { %2416 = vmatpush3.bf16.msra.mxu0 %v2844_v18 }
 0x5e1   :  { %2417 = vmatprep.subr.bf16.mxu0 %v2734_v0 }
 0x5e4   :  { %2419 = vmatpush3.bf16.msra.mxu0 %v2851_v22 }
 0x5e5   :  { %2420 = vmatprep.subr.bf16.mxu0 %v2734_v0 }
 0x5e8   :  { %2422 = vmatpush3.bf16.msra.mxu0 %v2857_v25 }
 0x5e9   :  { %2423 = vmatprep.subr.bf16.mxu0 %v2734_v0 }
 0x5ec   :  { %2425 = vmatpush3.bf16.msra.mxu0 %v2863_v28 }
 0x5ed   :  { %2450 = vmatprep.subr.bf16.mxu0 %v2734_v0 }
 0x6a2   :  { %v627_v32 = vpop.f32.mrb[6].mxu0 }
 0x6a3   :  { %v633_v33 = vadd.f32 %v632_v31, %v627_v32  ;;  %v1894_v34 = vpop.f32.mrb[7].mxu0  ;;  %v1112_v32 = vld [vmem:[#allocation3 + $0x60] sm:$0xff] }
 0x6a5   :  { %v634_v35 = vsub.f32 %v633_v33, %v556_v27 }
 0x6a7   :  { %v635_v36 = vmul.f32 0.2, %v634_v35 }
 0x6a9   :  { %v636_v37 = vadd.f32 %v635_v36, %v556_v27 }
 0x6ab   :  { %638 = vst [vmem:[#allocation9 + $0x30] sm:$0xff] %v636_v37  ;;  %v639_v38 = vadd.f32 %v636_v37, %v2841_v17 }
 0x6ad   :  { %2617 = vtanh.f32 %v639_v38 }
 0x6b7   :  { %v2618_v39 = vpop.eup %2617 }
 0x6b8   :  { %1928 = vmatmul.mubr.f32.vlgmr.msra.gmra.mrb[6].mxu1 %v2618_v39 }
 0x6b9   :  { %2428 = vmatpush3.bf16.msra.mxu1 %v2818_v5  ;;  %1997 = vmatprep.mubr.msk.f32.mxu1 %vm2735_vm0, %v2736_v1 }
 0x6ba   :  { %2429 = vmatprep.subr.bf16.mxu1 %v2734_v0 }
 0x6bd   :  { %2431 = vmatpush3.bf16.msra.mxu1 %v2821_v7 }
 0x6be   :  { %2432 = vmatprep.subr.bf16.mxu1 %v2734_v0 }
 0x6c1   :  { %2434 = vmatpush3.bf16.msra.mxu1 %v2827_v10 }
 0x6c2   :  { %2435 = vmatprep.subr.bf16.mxu1 %v2734_v0 }
 0x6c5   :  { %2437 = vmatpush3.bf16.msra.mxu1 %v2833_v13 }
 0x6c6   :  { %2438 = vmatprep.subr.bf16.mxu1 %v2734_v0 }
 0x6c9   :  { %2440 = vmatpush3.bf16.msra.mxu1 %v2844_v18 }
 0x6ca   :  { %2441 = vmatprep.subr.bf16.mxu1 %v2734_v0 }
 0x6cd   :  { %2443 = vmatpush3.bf16.msra.mxu1 %v2851_v22 }
 0x6ce   :  { %2444 = vmatprep.subr.bf16.mxu1 %v2734_v0 }
 0x6d1   :  { %2446 = vmatpush3.bf16.msra.mxu1 %v2857_v25 }
 0x6d2   :  { %2447 = vmatprep.subr.bf16.mxu1 %v2734_v0 }
 0x6d5   :  { %2449 = vmatpush3.bf16.msra.mxu1 %v2863_v28 }
 0x6d6   :  { %2474 = vmatprep.subr.bf16.mxu1 %v2734_v0 }
 0x78b   :  { %v707_v41 = vpop.f32.mrb[6].mxu1 }
 0x78c   :  { %v713_v42 = vadd.f32 %v712_v40, %v707_v41  ;;  %v1929_v43 = vpop.f32.mrb[7].mxu1 }
 0x78d   :  { %v1272_v43 = vld [vmem:[#allocation3 + $0x70] sm:$0xff] }
 0x78e   :  { %v714_v44 = vsub.f32 %v713_v42, %v636_v37 }
 0x790   :  { %v715_v45 = vmul.f32 0.2, %v714_v44 }
 0x792   :  { %v716_v46 = vadd.f32 %v715_v45, %v636_v37 }
 0x794   :  { %718 = vst [vmem:[#allocation9 + $0x38] sm:$0xff] %v716_v46  ;;  %v719_v47 = vadd.f32 %v716_v46, %v2841_v17 }
 0x796   :  { %2619 = vtanh.f32 %v719_v47 }
 0x7a0   :  { %v2620_v48 = vpop.eup %2619 }
 0x7a1   :  { %1963 = vmatmul.mubr.f32.vlgmr.msra.gmra.mrb[8].mxu0 %v2620_v48 }
 0x7a2   :  { %2452 = vmatpush3.bf16.msra.mxu0 %v2818_v5  ;;  %2032 = vmatprep.mubr.msk.f32.mxu0 %vm2735_vm0, %v2736_v1 }
 0x7a3   :  { %2453 = vmatprep.subr.bf16.mxu0 %v2734_v0 }
 0x7a6   :  { %2455 = vmatpush3.bf16.msra.mxu0 %v2821_v7 }
 0x7a7   :  { %2456 = vmatprep.subr.bf16.mxu0 %v2734_v0 }
 0x7aa   :  { %2458 = vmatpush3.bf16.msra.mxu0 %v2827_v10 }
 0x7ab   :  { %2459 = vmatprep.subr.bf16.mxu0 %v2734_v0 }
 0x7ae   :  { %2461 = vmatpush3.bf16.msra.mxu0 %v2833_v13 }
 0x7af   :  { %2462 = vmatprep.subr.bf16.mxu0 %v2734_v0 }
 0x7b2   :  { %2464 = vmatpush3.bf16.msra.mxu0 %v2844_v18 }
 0x7b3   :  { %2465 = vmatprep.subr.bf16.mxu0 %v2734_v0 }
 0x7b6   :  { %2467 = vmatpush3.bf16.msra.mxu0 %v2851_v22 }
 0x7b7   :  { %2468 = vmatprep.subr.bf16.mxu0 %v2734_v0 }
 0x7ba   :  { %2470 = vmatpush3.bf16.msra.mxu0 %v2857_v25 }
 0x7bb   :  { %2471 = vmatprep.subr.bf16.mxu0 %v2734_v0 }
 0x7be   :  { %2473 = vmatpush3.bf16.msra.mxu0 %v2863_v28 }
 0x7bf   :  { %2498 = vmatprep.subr.bf16.mxu0 %v2734_v0 }
 0x874   :  { %v787_v50 = vpop.f32.mrb[8].mxu0 }
 0x875   :  { %v793_v51 = vadd.f32 %v792_v49, %v787_v50  ;;  %v1964_v52 = vpop.f32.mrb[9].mxu0  ;;  %v1352_v49 = vld [vmem:[#allocation3 + $0x78] sm:$0xff] }
 0x877   :  { %v794_v53 = vsub.f32 %v793_v51, %v716_v46 }
 0x879   :  { %v795_v54 = vmul.f32 0.2, %v794_v53 }
 0x87b   :  { %v796_v55 = vadd.f32 %v795_v54, %v716_v46 }
 0x87d   :  { %798 = vst [vmem:[#allocation9 + $0x40] sm:$0xff] %v796_v55  ;;  %v799_v56 = vadd.f32 %v796_v55, %v2841_v17 }
 0x87f   :  { %2621 = vtanh.f32 %v799_v56 }
 0x889   :  { %v2622_v57 = vpop.eup %2621 }
 0x88a   :  { %1998 = vmatmul.mubr.f32.vlgmr.msra.gmra.mrb[8].mxu1 %v2622_v57 }
 0x88b   :  { %2476 = vmatpush3.bf16.msra.mxu1 %v2818_v5  ;;  %2067 = vmatprep.mubr.msk.f32.mxu1 %vm2735_vm0, %v2736_v1 }
 0x88c   :  { %2477 = vmatprep.subr.bf16.mxu1 %v2734_v0 }
 0x88f   :  { %2479 = vmatpush3.bf16.msra.mxu1 %v2821_v7 }
 0x890   :  { %2480 = vmatprep.subr.bf16.mxu1 %v2734_v0 }
 0x893   :  { %2482 = vmatpush3.bf16.msra.mxu1 %v2827_v10 }
 0x894   :  { %2483 = vmatprep.subr.bf16.mxu1 %v2734_v0 }
 0x897   :  { %2485 = vmatpush3.bf16.msra.mxu1 %v2833_v13 }
 0x898   :  { %2486 = vmatprep.subr.bf16.mxu1 %v2734_v0 }
 0x89b   :  { %2488 = vmatpush3.bf16.msra.mxu1 %v2844_v18 }
 0x89c   :  { %2489 = vmatprep.subr.bf16.mxu1 %v2734_v0 }
 0x89f   :  { %2491 = vmatpush3.bf16.msra.mxu1 %v2851_v22 }
 0x8a0   :  { %2492 = vmatprep.subr.bf16.mxu1 %v2734_v0 }
 0x8a3   :  { %2494 = vmatpush3.bf16.msra.mxu1 %v2857_v25 }
 0x8a4   :  { %2495 = vmatprep.subr.bf16.mxu1 %v2734_v0 }
 0x8a7   :  { %2497 = vmatpush3.bf16.msra.mxu1 %v2863_v28 }
 0x8a8   :  { %2522 = vmatprep.subr.bf16.mxu1 %v2734_v0 }
 0x95d   :  { %v867_v59 = vpop.f32.mrb[8].mxu1 }
 0x95e   :  { %v873_v60 = vadd.f32 %v872_v58, %v867_v59  ;;  %v1999_v61 = vpop.f32.mrb[9].mxu1 }
 0x960   :  { %v874_v62 = vsub.f32 %v873_v60, %v796_v55 }
 0x962   :  { %v875_v63 = vmul.f32 0.2, %v874_v62 }
 0x964   :  { %v876_v2 = vadd.f32 %v875_v63, %v796_v55 }
 0x966   :  { %878 = vst [vmem:[#allocation9 + $0x48] sm:$0xff] %v876_v2  ;;  %v879_v3 = vadd.f32 %v876_v2, %v2841_v17 }
 0x968   :  { %2623 = vtanh.f32 %v879_v3 }
 0x972   :  { %v2624_v4 = vpop.eup %2623 }
 0x973   :  { %2033 = vmatmul.mubr.f32.vlgmr.msra.gmra.mrb[10].mxu0 %v2624_v4 }
 0x974   :  { %2500 = vmatpush3.bf16.msra.mxu0 %v2818_v5  ;;  %2102 = vmatprep.mubr.msk.f32.mxu0 %vm2735_vm0, %v2736_v1 }
 0x975   :  { %2501 = vmatprep.subr.bf16.mxu0 %v2734_v0 }
 0x978   :  { %2503 = vmatpush3.bf16.msra.mxu0 %v2821_v7 }
 0x979   :  { %2504 = vmatprep.subr.bf16.mxu0 %v2734_v0 }
 0x97c   :  { %2506 = vmatpush3.bf16.msra.mxu0 %v2827_v10 }
 0x97d   :  { %2507 = vmatprep.subr.bf16.mxu0 %v2734_v0 }
 0x980   :  { %2509 = vmatpush3.bf16.msra.mxu0 %v2833_v13 }
 0x981   :  { %2510 = vmatprep.subr.bf16.mxu0 %v2734_v0 }
 0x984   :  { %2512 = vmatpush3.bf16.msra.mxu0 %v2844_v18 }
 0x985   :  { %2513 = vmatprep.subr.bf16.mxu0 %v2734_v0 }
 0x988   :  { %2515 = vmatpush3.bf16.msra.mxu0 %v2851_v22 }
 0x989   :  { %2516 = vmatprep.subr.bf16.mxu0 %v2734_v0 }
 0x98c   :  { %2518 = vmatpush3.bf16.msra.mxu0 %v2857_v25 }
 0x98d   :  { %2519 = vmatprep.subr.bf16.mxu0 %v2734_v0 }
 0x990   :  { %2521 = vmatpush3.bf16.msra.mxu0 %v2863_v28 }
 0x991   :  { %2546 = vmatprep.subr.bf16.mxu0 %v2734_v0 }
 0xa46   :  { %v947_v8 = vpop.f32.mrb[10].mxu0 }
 0xa47   :  { %v953_v9 = vadd.f32 %v952_v6, %v947_v8  ;;  %v2034_v11 = vpop.f32.mrb[11].mxu0 }
 0xa49   :  { %v954_v12 = vsub.f32 %v953_v9, %v876_v2 }
 0xa4b   :  { %v955_v14 = vmul.f32 0.2, %v954_v12 }
 0xa4d   :  { %v956_v15 = vadd.f32 %v955_v14, %v876_v2 }
 0xa4f   :  { %958 = vst [vmem:[#allocation9 + $0x50] sm:$0xff] %v956_v15  ;;  %v959_v16 = vadd.f32 %v956_v15, %v2841_v17 }
 0xa51   :  { %2625 = vtanh.f32 %v959_v16 }
 0xa5b   :  { %v2626_v19 = vpop.eup %2625 }
 0xa5c   :  { %2068 = vmatmul.mubr.f32.vlgmr.msra.gmra.mrb[10].mxu1 %v2626_v19 }
 0xa5d   :  { %2524 = vmatpush3.bf16.msra.mxu1 %v2818_v5  ;;  %2137 = vmatprep.mubr.msk.f32.mxu1 %vm2735_vm0, %v2736_v1 }
 0xa5e   :  { %2525 = vmatprep.subr.bf16.mxu1 %v2734_v0 }
 0xa61   :  { %2527 = vmatpush3.bf16.msra.mxu1 %v2821_v7 }
 0xa62   :  { %2528 = vmatprep.subr.bf16.mxu1 %v2734_v0 }
 0xa65   :  { %2530 = vmatpush3.bf16.msra.mxu1 %v2827_v10 }
 0xa66   :  { %2531 = vmatprep.subr.bf16.mxu1 %v2734_v0 }
 0xa69   :  { %2533 = vmatpush3.bf16.msra.mxu1 %v2833_v13 }
 0xa6a   :  { %2534 = vmatprep.subr.bf16.mxu1 %v2734_v0 }
 0xa6d   :  { %2536 = vmatpush3.bf16.msra.mxu1 %v2844_v18 }
 0xa6e   :  { %2537 = vmatprep.subr.bf16.mxu1 %v2734_v0 }
 0xa71   :  { %2539 = vmatpush3.bf16.msra.mxu1 %v2851_v22 }
 0xa72   :  { %2540 = vmatprep.subr.bf16.mxu1 %v2734_v0 }
 0xa75   :  { %2542 = vmatpush3.bf16.msra.mxu1 %v2857_v25 }
 0xa76   :  { %2543 = vmatprep.subr.bf16.mxu1 %v2734_v0 }
 0xa79   :  { %2545 = vmatpush3.bf16.msra.mxu1 %v2863_v28 }
 0xa7a   :  { %2570 = vmatprep.subr.bf16.mxu1 %v2734_v0 }
 0xb2f   :  { %v1027_v21 = vpop.f32.mrb[10].mxu1 }
 0xb30   :  { %v1033_v23 = vadd.f32 %v1032_v20, %v1027_v21  ;;  %v2069_v24 = vpop.f32.mrb[11].mxu1 }
 0xb32   :  { %v1034_v26 = vsub.f32 %v1033_v23, %v956_v15 }
 0xb34   :  { %v1035_v27 = vmul.f32 0.2, %v1034_v26 }
 0xb36   :  { %v1036_v29 = vadd.f32 %v1035_v27, %v956_v15 }
 0xb38   :  { %1038 = vst [vmem:[#allocation9 + $0x58] sm:$0xff] %v1036_v29  ;;  %v1039_v30 = vadd.f32 %v1036_v29, %v2841_v17 }
 0xb3a   :  { %2627 = vtanh.f32 %v1039_v30 }
 0xb44   :  { %v2628_v31 = vpop.eup %2627 }
 0xb45   :  { %2103 = vmatmul.mubr.f32.vlgmr.msra.gmra.mrb[12].mxu0 %v2628_v31 }
 0xb46   :  { %2548 = vmatpush3.bf16.msra.mxu0 %v2818_v5  ;;  %2172 = vmatprep.mubr.msk.f32.mxu0 %vm2735_vm0, %v2736_v1 }
 0xb47   :  { %2549 = vmatprep.subr.bf16.mxu0 %v2734_v0 }
 0xb4a   :  { %2551 = vmatpush3.bf16.msra.mxu0 %v2821_v7 }
 0xb4b   :  { %2552 = vmatprep.subr.bf16.mxu0 %v2734_v0 }
 0xb4e   :  { %2554 = vmatpush3.bf16.msra.mxu0 %v2827_v10 }
 0xb4f   :  { %2555 = vmatprep.subr.bf16.mxu0 %v2734_v0 }
 0xb52   :  { %2557 = vmatpush3.bf16.msra.mxu0 %v2833_v13 }
 0xb53   :  { %2558 = vmatprep.subr.bf16.mxu0 %v2734_v0 }
 0xb56   :  { %2560 = vmatpush3.bf16.msra.mxu0 %v2844_v18 }
 0xb57   :  { %2561 = vmatprep.subr.bf16.mxu0 %v2734_v0 }
 0xb5a   :  { %2563 = vmatpush3.bf16.msra.mxu0 %v2851_v22 }
 0xb5b   :  { %2564 = vmatprep.subr.bf16.mxu0 %v2734_v0 }
 0xb5e   :  { %2566 = vmatpush3.bf16.msra.mxu0 %v2857_v25 }
 0xb5f   :  { %2567 = vmatprep.subr.bf16.mxu0 %v2734_v0 }
 0xb62   :  { %2569 = vmatpush3.bf16.msra.mxu0 %v2863_v28 }
 0xc18   :  { %v1107_v33 = vpop.f32.mrb[12].mxu0 }
 0xc19   :  { %v1113_v34 = vadd.f32 %v1112_v32, %v1107_v33  ;;  %v2104_v35 = vpop.f32.mrb[13].mxu0 }
 0xc1b   :  { %v1114_v36 = vsub.f32 %v1113_v34, %v1036_v29 }
 0xc1d   :  { %v1115_v37 = vmul.f32 0.2, %v1114_v36 }
 0xc1f   :  { %v1116_v38 = vadd.f32 %v1115_v37, %v1036_v29 }
 0xc21   :  { %1118 = vst [vmem:[#allocation9 + $0x60] sm:$0xff] %v1116_v38  ;;  %v1119_v39 = vadd.f32 %v1116_v38, %v2841_v17 }
 0xc23   :  { %2629 = vtanh.f32 %v1119_v39 }
 0xc2d   :  { %v2630_v40 = vpop.eup %2629 }
 0xc2e   :  { %2138 = vmatmul.mubr.f32.vlgmr.msra.gmra.mrb[12].mxu1 %v2630_v40 }
 0xc2f   :  { %2572 = vmatpush3.bf16.msra.mxu1 %v2818_v5  ;;  %2207 = vmatprep.mubr.msk.f32.mxu1 %vm2735_vm0, %v2736_v1  ;;  %v1192_v1 = vld [vmem:[#allocation3 + $0x68] sm:$0xff] }
 0xc30   :  { %2573 = vmatprep.subr.bf16.mxu1 %v2734_v0 }
 0xc33   :  { %2575 = vmatpush3.bf16.msra.mxu1 %v2821_v7 }
 0xc34   :  { %2576 = vmatprep.subr.bf16.mxu1 %v2734_v0 }
 0xc37   :  { %2578 = vmatpush3.bf16.msra.mxu1 %v2827_v10 }
 0xc38   :  { %2579 = vmatprep.subr.bf16.mxu1 %v2734_v0 }
 0xc3b   :  { %2581 = vmatpush3.bf16.msra.mxu1 %v2833_v13 }
 0xc3c   :  { %2582 = vmatprep.subr.bf16.mxu1 %v2734_v0 }
 0xc3f   :  { %2584 = vmatpush3.bf16.msra.mxu1 %v2844_v18 }
 0xc40   :  { %2585 = vmatprep.subr.bf16.mxu1 %v2734_v0 }
 0xc43   :  { %2587 = vmatpush3.bf16.msra.mxu1 %v2851_v22 }
 0xc44   :  { %2588 = vmatprep.subr.bf16.mxu1 %v2734_v0 }
 0xc47   :  { %2590 = vmatpush3.bf16.msra.mxu1 %v2857_v25 }
 0xc48   :  { %2591 = vmatprep.subr.bf16.mxu1 %v2734_v0 }
 0xc4b   :  { %2593 = vmatpush3.bf16.msra.mxu1 %v2863_v28 }
 0xd01   :  { %v1187_v5 = vpop.f32.mrb[12].mxu1 }
 0xd02   :  { %v1193_v7 = vadd.f32 %v1192_v1, %v1187_v5  ;;  %v2139_v10 = vpop.f32.mrb[13].mxu1 }
 0xd04   :  { %v1194_v13 = vsub.f32 %v1193_v7, %v1116_v38 }
 0xd06   :  { %v1195_v41 = vmul.f32 0.2, %v1194_v13 }
 0xd08   :  { %v1196_v42 = vadd.f32 %v1195_v41, %v1116_v38 }
 0xd0a   :  { %1198 = vst [vmem:[#allocation9 + $0x68] sm:$0xff] %v1196_v42  ;;  %v1199_v18 = vadd.f32 %v1196_v42, %v2841_v17 }
 0xd0c   :  { %2631 = vtanh.f32 %v1199_v18 }
 0xd16   :  { %v2632_v22 = vpop.eup %2631 }
 0xd17   :  { %2173 = vmatmul.mubr.f32.vlgmr.msra.gmra.mrb[14].mxu0 %v2632_v22 }
 0xdea   :  { %v1267_v44 = vpop.f32.mrb[14].mxu0 }
 0xdeb   :  { %v1273_v25 = vadd.f32 %v1272_v43, %v1267_v44  ;;  %v2174_v45 = vpop.f32.mrb[15].mxu0 }
 0xded   :  { %v1274_v0 = vsub.f32 %v1273_v25, %v1196_v42 }
 0xdef   :  { %v1275_v46 = vmul.f32 0.2, %v1274_v0 }
 0xdf1   :  { %v1276_v28 = vadd.f32 %v1275_v46, %v1196_v42 }
 0xdf3   :  { %1278 = vst [vmem:[#allocation9 + $0x70] sm:$0xff] %v1276_v28  ;;  %v1279_v47 = vadd.f32 %v1276_v28, %v2841_v17 }
 0xdf5   :  { %2633 = vtanh.f32 %v1279_v47 }
 0xdff   :  { %v2634_v48 = vpop.eup %2633 }
 0xe00   :  { %2208 = vmatmul.mubr.f32.vlgmr.msra.gmra.mrb[14].mxu1 %v2634_v48 }
 0xed3   :  { %v1347_v50 = vpop.f32.mrb[14].mxu1 }
 0xed4   :  { %v1353_v51 = vadd.f32 %v1352_v49, %v1347_v50  ;;  %v2209_v52 = vpop.f32.mrb[15].mxu1 }
 0xed6   :  { %v1354_v53 = vsub.f32 %v1353_v51, %v1276_v28 }
 0xed8   :  { %v1355_v54 = vmul.f32 0.2, %v1354_v53 }
 0xeda   :  { %v1356_v55 = vadd.f32 %v1355_v54, %v1276_v28 }
 0xedc   :  { %1358 = vst [vmem:[#allocation9 + $0x78] sm:$0xff] %v1356_v55 }
 0xedd   :  { %2712 = shalt.err (!%p2709_p0)
}
 0xede   :  { %s2713_s30 = scalar_lea.hbm %s3156_s4, 2048 }
 0xedf   :  { %p2714_p1 = scmp.ne.s32.totalorder %s3156_s4, %s2713_s30  ;;  %p2717_p2 = scmp.lt.u32.totalorder %s2713_s30, %s3156_s4 }
 0xee1   :  { %p2719_p3 = pnand %p2717_p2, %p2714_p1 }
 0xee3   :  { %2722 = shalt.err (!%p2719_p3)
}
 0xee4   :  { %1371 = dma.vmem_to_hbm [thread:$0]  %s1366_s26, 2048, %s3156_s4, [#allocation5], %s2731_s1, %s2731_s1, %s2732_s11  }
 0xee5   :  { %2727 = dma.done.wait [#allocation5], 2048  }
 0xee6   :  { %2728 = vsyncadd [#allocation5], 4294965248 }
 0xee7   :  { %1375 = vsyncpa [#allocation4], 1 }
 0xee8   :  { %1376 = vsyncpa [#allocation7], 1 }
 0xee9   :  { %1377 = vsyncpa [#allocation5], 1 }

</bundles_post_ra>
